<compile_context>
chip_gen: v5e
topology: v5e:2x2
jax: 0.10.0
libtpu: 0.0.40
codegen_flags: <defaults>
</compile_context>

<pallas_src>
import functools
import math

import numpy as np
import jax
import jax.numpy as jnp
from jax import lax
from jax.experimental import pallas as pl
from jax.experimental.pallas import tpu as pltpu


def _round_up(x, m):
    return (x + m - 1) // m * m


def _tap_shifts(H, W, lanes):
    """Static circular lane shifts, taken mod the FULL block lane width, so that
    rolled[l] == x[l + dh*W + dw] for every in-image (unmasked) position."""
    return tuple((-((kh - 1) * W + (kw - 1))) % lanes
                 for kh in range(3) for kw in range(3))


def _tap_masks(H, W, B):
    """(9, B*H*W) float32 0/1 validity masks implementing SAME zero-padding,
    tiled across the B images folded into the lane dimension."""
    hh, ww = np.meshgrid(np.arange(H), np.arange(W), indexing="ij")
    rows = []
    for kh in range(3):
        for kw in range(3):
            dh, dw = kh - 1, kw - 1
            valid = ((hh + dh >= 0) & (hh + dh < H) &
                     (ww + dw >= 0) & (ww + dw < W))
            rows.append(valid.reshape(-1).astype(np.float32))
    m = np.stack(rows, axis=0)          # (9, H*W)
    return np.tile(m, (1, B))           # (9, B*H*W)


def _single_layer_kernel(x_ref, w1_ref, w2_ref, b2_ref, m_ref,
                         out_ref, p1_ref, *,
                         shifts, cin, cin_pad, ouc, lanes,
                         use_tanh, use_sig):
    """Fused conv3x3 -> conv3x3 (-> tanh -> sigmoid) for one batch chunk.

    x_ref:  (1, cin, lanes)        B images, channels-first, lanes = B*H*W
    w1_ref: (mid, 9*cin_pad)       conv1 weights, tap-major K, bias folded in col `cin`
    w2_ref: (9, ouc, mid)          conv2 weights, one (ouc, mid) slab per tap
    b2_ref: (ouc, 1)
    m_ref:  (9, lanes)             0/1 SAME-padding validity mask per tap
    out_ref:(1, ouc, lanes)
    p1_ref: (9*cin_pad, lanes)     VMEM im2col scratch for conv1 (persists over grid)
    """
    f32 = jnp.float32

    # One-time init: zero the padded K rows (never touched by the tap loop) and set
    # the bias ones-row.  Safe because the (only) grid axis is "arbitrary"
    # (sequential) and VMEM scratch persists across grid iterations.
    @pl.when(pl.program_id(0) == 0)
    def _():
        p1_ref[...] = jnp.zeros_like(p1_ref)
        p1_ref[cin:cin + 1, :] = jnp.ones((1, lanes), f32)   # bias row (tap 0 group)

    # ---- conv1: one wide-K matmul  h = W1 @ P1  (bias folded) -----------------
    x = x_ref[0]                                             # (cin, lanes)
    for t in range(9):
        rolled = x if shifts[t] == 0 else pltpu.roll(x, shift=shifts[t], axis=1)
        if shifts[t] != 0:                                   # center tap mask == 1
            rolled = rolled * m_ref[t:t + 1, :]
        p1_ref[t * cin_pad:t * cin_pad + cin, :] = rolled
    h = jnp.dot(w1_ref[...], p1_ref[...], preferred_element_type=f32)  # (mid, lanes)

    # ---- conv2: tap-accumulated, no im2col materialization --------------------
    acc = None
    for t in range(9):
        src = h if shifts[t] == 0 else pltpu.roll(h, shift=shifts[t], axis=1)
        if shifts[t] != 0:
            src = src * m_ref[t:t + 1, :]
        contrib = jnp.dot(w2_ref[t], src, preferred_element_type=f32)  # (ouc, lanes)
        acc = contrib if acc is None else acc + contrib
    y = acc + b2_ref[...]

    if use_tanh:
        y = jnp.tanh(y)
    if use_sig:
        y = jax.nn.sigmoid(y)
    out_ref[0] = y.astype(out_ref.dtype)


def single_layer_forward(x_nchw, params, *, tanh=False, sig=False, batch_block=None):
    """Pallas equivalent of SingleLayer.forward (NCHW in / NCHW out)."""
    w1, b1, w2, b2 = params                       # HWIO weights, 1-D biases
    N, cin, H, W = x_nchw.shape
    mid = w1.shape[-1]
    ouc = w2.shape[-1]
    HW = H * W

    # Fold several images into the lane dimension of one grid step (target ~1024
    # lanes) so matmuls, patch stores and the output vst are all wide.
    if batch_block is None:
        batch_block = max(1, min(N, 1024 // HW))
    B = batch_block
    nb = pl.cdiv(N, B)
    n_pad = nb * B
    lanes = B * HW

    # Conv1 K layout: (tap, padded channel).  cin_pad is padded past cin so one
    # spare row always exists to carry the folded bias (row `cin` of tap 0).
    cin_pad = _round_up(cin + 1, 8)

    # ---- one-off repack of the tiny weights (< 10 KB total) -------------------
    w1m = jnp.transpose(w1, (3, 0, 1, 2))                              # (mid,3,3,cin)
    w1m = jnp.pad(w1m, ((0, 0), (0, 0), (0, 0), (0, cin_pad - cin)))
    w1m = w1m.reshape(mid, 9 * cin_pad)
    w1m = w1m.at[:, cin].set(b1)                                       # fold bias1
    w2r = jnp.transpose(w2, (0, 1, 3, 2)).reshape(9, ouc, mid)         # (9,ouc,mid)
    b2c = b2.reshape(ouc, 1)

    # ---- pack activations: (N, cin, H, W) -> (nb, cin, B*HW) ------------------
    xb = x_nchw
    if n_pad != N:
        xb = jnp.pad(xb, ((0, n_pad - N), (0, 0), (0, 0), (0, 0)))
    x2d = (xb.reshape(nb, B, cin, HW)
             .transpose(0, 2, 1, 3)
             .reshape(nb, cin, lanes))

    masks = jnp.asarray(_tap_masks(H, W, B))                           # (9, lanes)

    kernel = functools.partial(
        _single_layer_kernel,
        shifts=_tap_shifts(H, W, lanes),
        cin=cin, cin_pad=cin_pad, ouc=ouc, lanes=lanes,
        use_tanh=tanh, use_sig=sig)

    out = pl.pallas_call(
        kernel,
        out_shape=jax.ShapeDtypeStruct((nb, ouc, lanes), x_nchw.dtype),
        grid=(nb,),
        in_specs=[
            pl.BlockSpec((1, cin, lanes), lambda n: (n, 0, 0)),        # batch chunk n
            pl.BlockSpec((mid, 9 * cin_pad), lambda n: (0, 0)),        # grid-invariant
            pl.BlockSpec((9, ouc, mid), lambda n: (0, 0, 0)),
            pl.BlockSpec((ouc, 1), lambda n: (0, 0)),
            pl.BlockSpec((9, lanes), lambda n: (0, 0)),
        ],
        out_specs=pl.BlockSpec((1, ouc, lanes), lambda n: (n, 0, 0)),
        scratch_shapes=[
            pltpu.VMEM((9 * cin_pad, lanes), jnp.float32),             # conv1 im2col
        ],
        # "arbitrary": state (zeroed pad rows + bias ones-row) is carried in scratch
        # across the batch axis, so it must not be core-split.
        compiler_params=pltpu.CompilerParams(
            dimension_semantics=("arbitrary",)),
    )(x2d, w1m, w2r, b2c, masks)

    # (nb, ouc, B*HW) -> (N, ouc, H, W)
    out = (out.reshape(nb, ouc, B, HW)
              .transpose(0, 2, 1, 3)
              .reshape(n_pad, ouc, H, W))
    return out[:N] if n_pad != N else out


def init_params(key, inc=32, ouc=3, k=3):
    """Deterministic Conv2d-style init (uniform +-1/sqrt(fan_in)), HWIO weights."""
    k1, k2, k3, k4 = jax.random.split(key, 4)
    bound1 = 1.0 / math.sqrt(3 * k * k)
    w1 = jax.random.uniform(k1, (k, k, 3, inc), jnp.float32, -bound1, bound1)
    b1 = jax.random.uniform(k2, (inc,), jnp.float32, -bound1, bound1)
    bound2 = 1.0 / math.sqrt(inc * k * k)
    w2 = jax.random.uniform(k3, (k, k, inc, ouc), jnp.float32, -bound2, bound2)
    b2 = jax.random.uniform(k4, (ouc,), jnp.float32, -bound2, bound2)
    return w1, b1, w2, b2


def _ref_forward(x_nchw, params, tanh=False, sig=False):
    """Plain-JAX reference (XLA conv) for correctness checking."""
    w1, b1, w2, b2 = params
    dn = ("NHWC", "HWIO", "NHWC")
    x = jnp.transpose(x_nchw, (0, 2, 3, 1))
    x = lax.conv_general_dilated(x, w1, (1, 1), "SAME", dimension_numbers=dn) + b1
    x = lax.conv_general_dilated(x, w2, (1, 1), "SAME", dimension_numbers=dn) + b2
    if tanh:
        x = jnp.tanh(x)
    if sig:
        x = jax.nn.sigmoid(x)
    return jnp.transpose(x, (0, 3, 1, 2))


if __name__ == "__main__":
    key = jax.random.PRNGKey(0)
    kx, kp = jax.random.split(key)

    # NCHW input with 3 channels (conv1 expects 3), inc=32, ouc=3, 16x16 spatial.
    x = jax.random.normal(kx, (2, 3, 16, 16), jnp.float32)
    params = init_params(kp, inc=32, ouc=3, k=3)

    # Default path (no activations) — matches SingleLayer(tanh=False, sig=False).
    fwd = jax.jit(functools.partial(single_layer_forward, tanh=False, sig=False))
    out = jax.block_until_ready(fwd(x, params))
    ref = _ref_forward(x, params)
    assert out.shape == (2, 3, 16, 16), out.shape
    assert jnp.allclose(out, ref, atol=1e-4, rtol=1e-4), \
        float(jnp.max(jnp.abs(out - ref)))

    # Fused tanh -> sigmoid path.
    fwd_act = jax.jit(functools.partial(single_layer_forward, tanh=True, sig=True))
    out2 = jax.block_until_ready(fwd_act(x, params))
    ref2 = _ref_forward(x, params, tanh=True, sig=True)
    assert jnp.allclose(out2, ref2, atol=1e-4, rtol=1e-4), \
        float(jnp.max(jnp.abs(out2 - ref2)))

    print("KERNEL_OK")
</pallas_src>

<mosaic_0001>
module attributes {stable_mosaic.version = 11 : i64} {
  func.func @_single_layer_kernel(%arg0: i32, %arg1: memref<1x3x512xf32, #tpu.memory_space<vmem>>, %arg2: memref<32x72xf32, #tpu.memory_space<vmem>>, %arg3: memref<9x3x32xf32, #tpu.memory_space<vmem>>, %arg4: memref<3x1xf32, #tpu.memory_space<vmem>>, %arg5: memref<9x512xf32, #tpu.memory_space<vmem>>, %arg6: memref<1x3x512xf32, #tpu.memory_space<vmem>>, %arg7: memref<72x512xf32, #tpu.memory_space<vmem>>) attributes {dimension_semantics = [#tpu.dimension_semantics<arbitrary>], iteration_bounds = array<i64: 1>, scalar_prefetch = 0 : i64, scratch_operands = 1 : i64, tpu.core_type = #tpu.core_type<tc>, window_params = [{transform_indices = @transform_0, window_bounds = array<i64: 1, 3, 512>}, {pipeline_mode = #tpu.pipeline_mode<synchronous>, transform_indices = @transform_1, window_bounds = array<i64: 32, 72>}, {pipeline_mode = #tpu.pipeline_mode<synchronous>, transform_indices = @transform_2, window_bounds = array<i64: 9, 3, 32>}, {pipeline_mode = #tpu.pipeline_mode<synchronous>, transform_indices = @transform_3, window_bounds = array<i64: 3, 1>}, {pipeline_mode = #tpu.pipeline_mode<synchronous>, transform_indices = @transform_4, window_bounds = array<i64: 9, 512>}, {transform_indices = @transform_5, window_bounds = array<i64: 1, 3, 512>}]} {
    %c0_i32 = arith.constant 0 : i32
    %0 = arith.cmpi eq, %arg0, %c0_i32 : i32
    %1 = arith.extui %0 : i1 to i32
    %c0_i32_0 = arith.constant 0 : i32
    %2 = arith.cmpi ne, %1, %c0_i32_0 : i32
    scf.if %2 {
      %cst_91 = arith.constant 0.000000e+00 : f32
      %122 = vector.broadcast %cst_91 : f32 to vector<72x512xf32>
      %c0_92 = arith.constant 0 : index
      %c0_93 = arith.constant 0 : index
      %123 = vector.load %arg7[%c0_92, %c0_93] : memref<72x512xf32, #tpu.memory_space<vmem>>, vector<72x512xf32>
      tpu.vector_store %arg7[%c0_92, %c0_93], %122 {strides = array<i32>} : memref<72x512xf32, #tpu.memory_space<vmem>>, vector<72x512xf32>,
      %cst_94 = arith.constant 1.000000e+00 : f32
      %124 = vector.broadcast %cst_94 : f32 to vector<1x512xf32>
      %c3_95 = arith.constant 3 : index
      %c0_96 = arith.constant 0 : index
      %125 = vector.load %arg7[%c3_95, %c0_96] : memref<72x512xf32, #tpu.memory_space<vmem>>, vector<1x512xf32>
      tpu.vector_store %arg7[%c3_95, %c0_96], %124 {strides = array<i32>} : memref<72x512xf32, #tpu.memory_space<vmem>>, vector<1x512xf32>,
    } else {
    }
    %c0 = arith.constant 0 : index
    %c0_1 = arith.constant 0 : index
    %c0_2 = arith.constant 0 : index
    %3 = vector.load %arg1[%c0, %c0_1, %c0_2] : memref<1x3x512xf32, #tpu.memory_space<vmem>>, vector<1x3x512xf32>
    %4 = vector.shape_cast %3 : vector<1x3x512xf32> to vector<3x512xf32>
    %c17_i32 = arith.constant 17 : i32
    %5 = tpu.dynamic_rotate %4 by %c17_i32 dim 1 : vector<3x512xf32>, i32 -> vector<3x512xf32>
    %c0_3 = arith.constant 0 : index
    %c0_4 = arith.constant 0 : index
    %6 = vector.load %arg5[%c0_3, %c0_4] : memref<9x512xf32, #tpu.memory_space<vmem>>, vector<1x512xf32>
    %7 = vector.broadcast %6 : vector<1x512xf32> to vector<3x512xf32>
    %8 = arith.mulf %5, %7 : vector<3x512xf32>
    %c0_5 = arith.constant 0 : index
    %c0_6 = arith.constant 0 : index
    %9 = vector.load %arg7[%c0_5, %c0_6] : memref<72x512xf32, #tpu.memory_space<vmem>>, vector<3x512xf32>
    tpu.vector_store %arg7[%c0_5, %c0_6], %8 {strides = array<i32>} : memref<72x512xf32, #tpu.memory_space<vmem>>, vector<3x512xf32>,
    %c16_i32 = arith.constant 16 : i32
    %10 = tpu.dynamic_rotate %4 by %c16_i32 dim 1 : vector<3x512xf32>, i32 -> vector<3x512xf32>
    %c1 = arith.constant 1 : index
    %c0_7 = arith.constant 0 : index
    %11 = vector.load %arg5[%c1, %c0_7] : memref<9x512xf32, #tpu.memory_space<vmem>>, vector<1x512xf32>
    %12 = vector.broadcast %11 : vector<1x512xf32> to vector<3x512xf32>
    %13 = arith.mulf %10, %12 : vector<3x512xf32>
    %c8 = arith.constant 8 : index
    %c0_8 = arith.constant 0 : index
    %14 = vector.load %arg7[%c8, %c0_8] : memref<72x512xf32, #tpu.memory_space<vmem>>, vector<3x512xf32>
    tpu.vector_store %arg7[%c8, %c0_8], %13 {strides = array<i32>} : memref<72x512xf32, #tpu.memory_space<vmem>>, vector<3x512xf32>,
    %c15_i32 = arith.constant 15 : i32
    %15 = tpu.dynamic_rotate %4 by %c15_i32 dim 1 : vector<3x512xf32>, i32 -> vector<3x512xf32>
    %c2 = arith.constant 2 : index
    %c0_9 = arith.constant 0 : index
    %16 = vector.load %arg5[%c2, %c0_9] : memref<9x512xf32, #tpu.memory_space<vmem>>, vector<1x512xf32>
    %17 = vector.broadcast %16 : vector<1x512xf32> to vector<3x512xf32>
    %18 = arith.mulf %15, %17 : vector<3x512xf32>
    %c16 = arith.constant 16 : index
    %c0_10 = arith.constant 0 : index
    %19 = vector.load %arg7[%c16, %c0_10] : memref<72x512xf32, #tpu.memory_space<vmem>>, vector<3x512xf32>
    tpu.vector_store %arg7[%c16, %c0_10], %18 {strides = array<i32>} : memref<72x512xf32, #tpu.memory_space<vmem>>, vector<3x512xf32>,
    %c1_i32 = arith.constant 1 : i32
    %20 = tpu.dynamic_rotate %4 by %c1_i32 dim 1 : vector<3x512xf32>, i32 -> vector<3x512xf32>
    %c3 = arith.constant 3 : index
    %c0_11 = arith.constant 0 : index
    %21 = vector.load %arg5[%c3, %c0_11] : memref<9x512xf32, #tpu.memory_space<vmem>>, vector<1x512xf32>
    %22 = vector.broadcast %21 : vector<1x512xf32> to vector<3x512xf32>
    %23 = arith.mulf %20, %22 : vector<3x512xf32>
    %c24 = arith.constant 24 : index
    %c0_12 = arith.constant 0 : index
    %24 = vector.load %arg7[%c24, %c0_12] : memref<72x512xf32, #tpu.memory_space<vmem>>, vector<3x512xf32>
    tpu.vector_store %arg7[%c24, %c0_12], %23 {strides = array<i32>} : memref<72x512xf32, #tpu.memory_space<vmem>>, vector<3x512xf32>,
    %c32 = arith.constant 32 : index
    %c0_13 = arith.constant 0 : index
    %25 = vector.load %arg7[%c32, %c0_13] : memref<72x512xf32, #tpu.memory_space<vmem>>, vector<3x512xf32>
    tpu.vector_store %arg7[%c32, %c0_13], %4 {strides = array<i32>} : memref<72x512xf32, #tpu.memory_space<vmem>>, vector<3x512xf32>,
    %c511_i32 = arith.constant 511 : i32
    %26 = tpu.dynamic_rotate %4 by %c511_i32 dim 1 : vector<3x512xf32>, i32 -> vector<3x512xf32>
    %c5 = arith.constant 5 : index
    %c0_14 = arith.constant 0 : index
    %27 = vector.load %arg5[%c5, %c0_14] : memref<9x512xf32, #tpu.memory_space<vmem>>, vector<1x512xf32>
    %28 = vector.broadcast %27 : vector<1x512xf32> to vector<3x512xf32>
    %29 = arith.mulf %26, %28 : vector<3x512xf32>
    %c40 = arith.constant 40 : index
    %c0_15 = arith.constant 0 : index
    %30 = vector.load %arg7[%c40, %c0_15] : memref<72x512xf32, #tpu.memory_space<vmem>>, vector<3x512xf32>
    tpu.vector_store %arg7[%c40, %c0_15], %29 {strides = array<i32>} : memref<72x512xf32, #tpu.memory_space<vmem>>, vector<3x512xf32>,
    %c497_i32 = arith.constant 497 : i32
    %31 = tpu.dynamic_rotate %4 by %c497_i32 dim 1 : vector<3x512xf32>, i32 -> vector<3x512xf32>
    %c6 = arith.constant 6 : index
    %c0_16 = arith.constant 0 : index
    %32 = vector.load %arg5[%c6, %c0_16] : memref<9x512xf32, #tpu.memory_space<vmem>>, vector<1x512xf32>
    %33 = vector.broadcast %32 : vector<1x512xf32> to vector<3x512xf32>
    %34 = arith.mulf %31, %33 : vector<3x512xf32>
    %c48 = arith.constant 48 : index
    %c0_17 = arith.constant 0 : index
    %35 = vector.load %arg7[%c48, %c0_17] : memref<72x512xf32, #tpu.memory_space<vmem>>, vector<3x512xf32>
    tpu.vector_store %arg7[%c48, %c0_17], %34 {strides = array<i32>} : memref<72x512xf32, #tpu.memory_space<vmem>>, vector<3x512xf32>,
    %c496_i32 = arith.constant 496 : i32
    %36 = tpu.dynamic_rotate %4 by %c496_i32 dim 1 : vector<3x512xf32>, i32 -> vector<3x512xf32>
    %c7 = arith.constant 7 : index
    %c0_18 = arith.constant 0 : index
    %37 = vector.load %arg5[%c7, %c0_18] : memref<9x512xf32, #tpu.memory_space<vmem>>, vector<1x512xf32>
    %38 = vector.broadcast %37 : vector<1x512xf32> to vector<3x512xf32>
    %39 = arith.mulf %36, %38 : vector<3x512xf32>
    %c56 = arith.constant 56 : index
    %c0_19 = arith.constant 0 : index
    %40 = vector.load %arg7[%c56, %c0_19] : memref<72x512xf32, #tpu.memory_space<vmem>>, vector<3x512xf32>
    tpu.vector_store %arg7[%c56, %c0_19], %39 {strides = array<i32>} : memref<72x512xf32, #tpu.memory_space<vmem>>, vector<3x512xf32>,
    %c495_i32 = arith.constant 495 : i32
    %41 = tpu.dynamic_rotate %4 by %c495_i32 dim 1 : vector<3x512xf32>, i32 -> vector<3x512xf32>
    %c8_20 = arith.constant 8 : index
    %c0_21 = arith.constant 0 : index
    %42 = vector.load %arg5[%c8_20, %c0_21] : memref<9x512xf32, #tpu.memory_space<vmem>>, vector<1x512xf32>
    %43 = vector.broadcast %42 : vector<1x512xf32> to vector<3x512xf32>
    %44 = arith.mulf %41, %43 : vector<3x512xf32>
    %c64 = arith.constant 64 : index
    %c0_22 = arith.constant 0 : index
    %45 = vector.load %arg7[%c64, %c0_22] : memref<72x512xf32, #tpu.memory_space<vmem>>, vector<3x512xf32>
    tpu.vector_store %arg7[%c64, %c0_22], %44 {strides = array<i32>} : memref<72x512xf32, #tpu.memory_space<vmem>>, vector<3x512xf32>,
    %c0_23 = arith.constant 0 : index
    %c0_24 = arith.constant 0 : index
    %46 = vector.load %arg2[%c0_23, %c0_24] : memref<32x72xf32, #tpu.memory_space<vmem>>, vector<32x72xf32>
    %c0_25 = arith.constant 0 : index
    %c0_26 = arith.constant 0 : index
    %47 = vector.load %arg7[%c0_25, %c0_26] : memref<72x512xf32, #tpu.memory_space<vmem>>, vector<72x512xf32>
    %cst = arith.constant dense<0.000000e+00> : vector<32x512xf32>
    %48 = tpu.matmul %46, %47, %cst {dimension_numbers = #tpu.dot_dimension_numbers<[1], [0], [0], [1], [0, 0, 1, 1], [], []>} : vector<32x72xf32>, vector<72x512xf32>, vector<32x512xf32> -> vector<32x512xf32>
    %c17_i32_27 = arith.constant 17 : i32
    %49 = tpu.dynamic_rotate %48 by %c17_i32_27 dim 1 : vector<32x512xf32>, i32 -> vector<32x512xf32>
    %c0_28 = arith.constant 0 : index
    %c0_29 = arith.constant 0 : index
    %50 = vector.load %arg5[%c0_28, %c0_29] : memref<9x512xf32, #tpu.memory_space<vmem>>, vector<1x512xf32>
    %51 = vector.broadcast %50 : vector<1x512xf32> to vector<32x512xf32>
    %52 = arith.mulf %49, %51 : vector<32x512xf32>
    %c0_30 = arith.constant 0 : index
    %c0_31 = arith.constant 0 : index
    %c0_32 = arith.constant 0 : index
    %53 = vector.load %arg3[%c0_30, %c0_31, %c0_32] : memref<9x3x32xf32, #tpu.memory_space<vmem>>, vector<1x3x32xf32>
    %54 = vector.shape_cast %53 : vector<1x3x32xf32> to vector<3x32xf32>
    %cst_33 = arith.constant dense<0.000000e+00> : vector<3x512xf32>
    %55 = tpu.matmul %54, %52, %cst_33 {dimension_numbers = #tpu.dot_dimension_numbers<[1], [0], [0], [1], [0, 0, 1, 1], [], []>} : vector<3x32xf32>, vector<32x512xf32>, vector<3x512xf32> -> vector<3x512xf32>
    %c16_i32_34 = arith.constant 16 : i32
    %56 = tpu.dynamic_rotate %48 by %c16_i32_34 dim 1 : vector<32x512xf32>, i32 -> vector<32x512xf32>
    %c1_35 = arith.constant 1 : index
    %c0_36 = arith.constant 0 : index
    %57 = vector.load %arg5[%c1_35, %c0_36] : memref<9x512xf32, #tpu.memory_space<vmem>>, vector<1x512xf32>
    %58 = vector.broadcast %57 : vector<1x512xf32> to vector<32x512xf32>
    %59 = arith.mulf %56, %58 : vector<32x512xf32>
    %c1_37 = arith.constant 1 : index
    %c0_38 = arith.constant 0 : index
    %c0_39 = arith.constant 0 : index
    %60 = vector.load %arg3[%c1_37, %c0_38, %c0_39] : memref<9x3x32xf32, #tpu.memory_space<vmem>>, vector<1x3x32xf32>
    %61 = vector.shape_cast %60 : vector<1x3x32xf32> to vector<3x32xf32>
    %cst_40 = arith.constant dense<0.000000e+00> : vector<3x512xf32>
    %62 = tpu.matmul %61, %59, %cst_40 {dimension_numbers = #tpu.dot_dimension_numbers<[1], [0], [0], [1], [0, 0, 1, 1], [], []>} : vector<3x32xf32>, vector<32x512xf32>, vector<3x512xf32> -> vector<3x512xf32>
    %63 = arith.addf %55, %62 : vector<3x512xf32>
    %c15_i32_41 = arith.constant 15 : i32
    %64 = tpu.dynamic_rotate %48 by %c15_i32_41 dim 1 : vector<32x512xf32>, i32 -> vector<32x512xf32>
    %c2_42 = arith.constant 2 : index
    %c0_43 = arith.constant 0 : index
    %65 = vector.load %arg5[%c2_42, %c0_43] : memref<9x512xf32, #tpu.memory_space<vmem>>, vector<1x512xf32>
    %66 = vector.broadcast %65 : vector<1x512xf32> to vector<32x512xf32>
    %67 = arith.mulf %64, %66 : vector<32x512xf32>
    %c2_44 = arith.constant 2 : index
    %c0_45 = arith.constant 0 : index
    %c0_46 = arith.constant 0 : index
    %68 = vector.load %arg3[%c2_44, %c0_45, %c0_46] : memref<9x3x32xf32, #tpu.memory_space<vmem>>, vector<1x3x32xf32>
    %69 = vector.shape_cast %68 : vector<1x3x32xf32> to vector<3x32xf32>
    %cst_47 = arith.constant dense<0.000000e+00> : vector<3x512xf32>
    %70 = tpu.matmul %69, %67, %cst_47 {dimension_numbers = #tpu.dot_dimension_numbers<[1], [0], [0], [1], [0, 0, 1, 1], [], []>} : vector<3x32xf32>, vector<32x512xf32>, vector<3x512xf32> -> vector<3x512xf32>
    %71 = arith.addf %63, %70 : vector<3x512xf32>
    %c1_i32_48 = arith.constant 1 : i32
    %72 = tpu.dynamic_rotate %48 by %c1_i32_48 dim 1 : vector<32x512xf32>, i32 -> vector<32x512xf32>
    %c3_49 = arith.constant 3 : index
    %c0_50 = arith.constant 0 : index
    %73 = vector.load %arg5[%c3_49, %c0_50] : memref<9x512xf32, #tpu.memory_space<vmem>>, vector<1x512xf32>
    %74 = vector.broadcast %73 : vector<1x512xf32> to vector<32x512xf32>
    %75 = arith.mulf %72, %74 : vector<32x512xf32>
    %c3_51 = arith.constant 3 : index
    %c0_52 = arith.constant 0 : index
    %c0_53 = arith.constant 0 : index
    %76 = vector.load %arg3[%c3_51, %c0_52, %c0_53] : memref<9x3x32xf32, #tpu.memory_space<vmem>>, vector<1x3x32xf32>
    %77 = vector.shape_cast %76 : vector<1x3x32xf32> to vector<3x32xf32>
    %cst_54 = arith.constant dense<0.000000e+00> : vector<3x512xf32>
    %78 = tpu.matmul %77, %75, %cst_54 {dimension_numbers = #tpu.dot_dimension_numbers<[1], [0], [0], [1], [0, 0, 1, 1], [], []>} : vector<3x32xf32>, vector<32x512xf32>, vector<3x512xf32> -> vector<3x512xf32>
    %79 = arith.addf %71, %78 : vector<3x512xf32>
    %c4 = arith.constant 4 : index
    %c0_55 = arith.constant 0 : index
    %c0_56 = arith.constant 0 : index
    %80 = vector.load %arg3[%c4, %c0_55, %c0_56] : memref<9x3x32xf32, #tpu.memory_space<vmem>>, vector<1x3x32xf32>
    %81 = vector.shape_cast %80 : vector<1x3x32xf32> to vector<3x32xf32>
    %cst_57 = arith.constant dense<0.000000e+00> : vector<3x512xf32>
    %82 = tpu.matmul %81, %48, %cst_57 {dimension_numbers = #tpu.dot_dimension_numbers<[1], [0], [0], [1], [0, 0, 1, 1], [], []>} : vector<3x32xf32>, vector<32x512xf32>, vector<3x512xf32> -> vector<3x512xf32>
    %83 = arith.addf %79, %82 : vector<3x512xf32>
    %c511_i32_58 = arith.constant 511 : i32
    %84 = tpu.dynamic_rotate %48 by %c511_i32_58 dim 1 : vector<32x512xf32>, i32 -> vector<32x512xf32>
    %c5_59 = arith.constant 5 : index
    %c0_60 = arith.constant 0 : index
    %85 = vector.load %arg5[%c5_59, %c0_60] : memref<9x512xf32, #tpu.memory_space<vmem>>, vector<1x512xf32>
    %86 = vector.broadcast %85 : vector<1x512xf32> to vector<32x512xf32>
    %87 = arith.mulf %84, %86 : vector<32x512xf32>
    %c5_61 = arith.constant 5 : index
    %c0_62 = arith.constant 0 : index
    %c0_63 = arith.constant 0 : index
    %88 = vector.load %arg3[%c5_61, %c0_62, %c0_63] : memref<9x3x32xf32, #tpu.memory_space<vmem>>, vector<1x3x32xf32>
    %89 = vector.shape_cast %88 : vector<1x3x32xf32> to vector<3x32xf32>
    %cst_64 = arith.constant dense<0.000000e+00> : vector<3x512xf32>
    %90 = tpu.matmul %89, %87, %cst_64 {dimension_numbers = #tpu.dot_dimension_numbers<[1], [0], [0], [1], [0, 0, 1, 1], [], []>} : vector<3x32xf32>, vector<32x512xf32>, vector<3x512xf32> -> vector<3x512xf32>
    %91 = arith.addf %83, %90 : vector<3x512xf32>
    %c497_i32_65 = arith.constant 497 : i32
    %92 = tpu.dynamic_rotate %48 by %c497_i32_65 dim 1 : vector<32x512xf32>, i32 -> vector<32x512xf32>
    %c6_66 = arith.constant 6 : index
    %c0_67 = arith.constant 0 : index
    %93 = vector.load %arg5[%c6_66, %c0_67] : memref<9x512xf32, #tpu.memory_space<vmem>>, vector<1x512xf32>
    %94 = vector.broadcast %93 : vector<1x512xf32> to vector<32x512xf32>
    %95 = arith.mulf %92, %94 : vector<32x512xf32>
    %c6_68 = arith.constant 6 : index
    %c0_69 = arith.constant 0 : index
    %c0_70 = arith.constant 0 : index
    %96 = vector.load %arg3[%c6_68, %c0_69, %c0_70] : memref<9x3x32xf32, #tpu.memory_space<vmem>>, vector<1x3x32xf32>
    %97 = vector.shape_cast %96 : vector<1x3x32xf32> to vector<3x32xf32>
    %cst_71 = arith.constant dense<0.000000e+00> : vector<3x512xf32>
    %98 = tpu.matmul %97, %95, %cst_71 {dimension_numbers = #tpu.dot_dimension_numbers<[1], [0], [0], [1], [0, 0, 1, 1], [], []>} : vector<3x32xf32>, vector<32x512xf32>, vector<3x512xf32> -> vector<3x512xf32>
    %99 = arith.addf %91, %98 : vector<3x512xf32>
    %c496_i32_72 = arith.constant 496 : i32
    %100 = tpu.dynamic_rotate %48 by %c496_i32_72 dim 1 : vector<32x512xf32>, i32 -> vector<32x512xf32>
    %c7_73 = arith.constant 7 : index
    %c0_74 = arith.constant 0 : index
    %101 = vector.load %arg5[%c7_73, %c0_74] : memref<9x512xf32, #tpu.memory_space<vmem>>, vector<1x512xf32>
    %102 = vector.broadcast %101 : vector<1x512xf32> to vector<32x512xf32>
    %103 = arith.mulf %100, %102 : vector<32x512xf32>
    %c7_75 = arith.constant 7 : index
    %c0_76 = arith.constant 0 : index
    %c0_77 = arith.constant 0 : index
    %104 = vector.load %arg3[%c7_75, %c0_76, %c0_77] : memref<9x3x32xf32, #tpu.memory_space<vmem>>, vector<1x3x32xf32>
    %105 = vector.shape_cast %104 : vector<1x3x32xf32> to vector<3x32xf32>
    %cst_78 = arith.constant dense<0.000000e+00> : vector<3x512xf32>
    %106 = tpu.matmul %105, %103, %cst_78 {dimension_numbers = #tpu.dot_dimension_numbers<[1], [0], [0], [1], [0, 0, 1, 1], [], []>} : vector<3x32xf32>, vector<32x512xf32>, vector<3x512xf32> -> vector<3x512xf32>
    %107 = arith.addf %99, %106 : vector<3x512xf32>
    %c495_i32_79 = arith.constant 495 : i32
    %108 = tpu.dynamic_rotate %48 by %c495_i32_79 dim 1 : vector<32x512xf32>, i32 -> vector<32x512xf32>
    %c8_80 = arith.constant 8 : index
    %c0_81 = arith.constant 0 : index
    %109 = vector.load %arg5[%c8_80, %c0_81] : memref<9x512xf32, #tpu.memory_space<vmem>>, vector<1x512xf32>
    %110 = vector.broadcast %109 : vector<1x512xf32> to vector<32x512xf32>
    %111 = arith.mulf %108, %110 : vector<32x512xf32>
    %c8_82 = arith.constant 8 : index
    %c0_83 = arith.constant 0 : index
    %c0_84 = arith.constant 0 : index
    %112 = vector.load %arg3[%c8_82, %c0_83, %c0_84] : memref<9x3x32xf32, #tpu.memory_space<vmem>>, vector<1x3x32xf32>
    %113 = vector.shape_cast %112 : vector<1x3x32xf32> to vector<3x32xf32>
    %cst_85 = arith.constant dense<0.000000e+00> : vector<3x512xf32>
    %114 = tpu.matmul %113, %111, %cst_85 {dimension_numbers = #tpu.dot_dimension_numbers<[1], [0], [0], [1], [0, 0, 1, 1], [], []>} : vector<3x32xf32>, vector<32x512xf32>, vector<3x512xf32> -> vector<3x512xf32>
    %115 = arith.addf %107, %114 : vector<3x512xf32>
    %c0_86 = arith.constant 0 : index
    %c0_87 = arith.constant 0 : index
    %116 = vector.load %arg4[%c0_86, %c0_87] : memref<3x1xf32, #tpu.memory_space<vmem>>, vector<3x1xf32>
    %117 = vector.broadcast %116 : vector<3x1xf32> to vector<3x512xf32>
    %118 = arith.addf %115, %117 : vector<3x512xf32>
    %c0_88 = arith.constant 0 : index
    %c0_89 = arith.constant 0 : index
    %c0_90 = arith.constant 0 : index
    %119 = vector.load %arg6[%c0_88, %c0_89, %c0_90] : memref<1x3x512xf32, #tpu.memory_space<vmem>>, vector<1x3x512xf32>
    %120 = vector.shape_cast %119 : vector<1x3x512xf32> to vector<3x512xf32>
    %121 = vector.shape_cast %118 : vector<3x512xf32> to vector<1x3x512xf32>
    tpu.vector_store %arg6[%c0_88, %c0_89, %c0_90], %121 {strides = array<i32>} : memref<1x3x512xf32, #tpu.memory_space<vmem>>, vector<1x3x512xf32>,
    return
  }
  func.func @transform_0(%arg0: i32) -> (i32, i32, i32) {
    %c0_i32 = arith.constant 0 : i32
    %c0_i32_0 = arith.constant 0 : i32
    %c0_i32_1 = arith.constant 0 : i32
    return %arg0, %c0_i32, %c0_i32_0 : i32, i32, i32
  }
  func.func @transform_1(%arg0: i32) -> (i32, i32) {
    %c0_i32 = arith.constant 0 : i32
    %c0_i32_0 = arith.constant 0 : i32
    %c0_i32_1 = arith.constant 0 : i32
    return %c0_i32, %c0_i32_0 : i32, i32
  }
  func.func @transform_2(%arg0: i32) -> (i32, i32, i32) {
    %c0_i32 = arith.constant 0 : i32
    %c0_i32_0 = arith.constant 0 : i32
    %c0_i32_1 = arith.constant 0 : i32
    %c0_i32_2 = arith.constant 0 : i32
    return %c0_i32, %c0_i32_0, %c0_i32_1 : i32, i32, i32
  }
  func.func @transform_3(%arg0: i32) -> (i32, i32) {
    %c0_i32 = arith.constant 0 : i32
    %c0_i32_0 = arith.constant 0 : i32
    %c0_i32_1 = arith.constant 0 : i32
    return %c0_i32, %c0_i32_0 : i32, i32
  }
  func.func @transform_4(%arg0: i32) -> (i32, i32) {
    %c0_i32 = arith.constant 0 : i32
    %c0_i32_0 = arith.constant 0 : i32
    %c0_i32_1 = arith.constant 0 : i32
    return %c0_i32, %c0_i32_0 : i32, i32
  }
  func.func @transform_5(%arg0: i32) -> (i32, i32, i32) {
    %c0_i32 = arith.constant 0 : i32
    %c0_i32_0 = arith.constant 0 : i32
    %c0_i32_1 = arith.constant 0 : i32
    return %arg0, %c0_i32, %c0_i32_0 : i32, i32, i32
  }
}

</mosaic_0001>

<bundles_post_ra>
// kernel: single_layer_forward.1
= control target key start
LH: loop header
LB: loop body
LE: loop exit
PB: predicated region body
PF: predicated region fallthrough
CT: control target
= control target key end

     0   :  { %s2099_s22 = smov 17   ;;  %s2101_s23 = smov 15   ;;  %v2107_v38 = vmov 0.0   ;;  %v60_v41 = vlaneseq  ;;  %v2108_v50 = vmov 1.0   ;;  %vm471_vm9 = vcmask 588800   ;;  %s3498_s0 = inlined_call_operand.vmem [shape: f32[1,3,512], index: 0, kind: input, shape index: {}]   ;;  %s3499_s4 = inlined_call_operand.vmem [shape: f32[9,512], index: 4, kind: input, shape index: {}]   ;;  %s3500_s1 = inlined_call_operand.vmem [shape: f32[32,72], index: 1, kind: input, shape index: {}]   ;;  %s3501_s2 = inlined_call_operand.vmem [shape: f32[9,3,32], index: 2, kind: input, shape index: {}]   ;;  %s3502_s3 = inlined_call_operand.vmem [shape: f32[3,1], index: 3, kind: input, shape index: {}]   ;;  %s3503_s5 = inlined_call_operand.vmem [shape: f32[1,3,512], index: 5, kind: output, shape index: {}]  }
   0x1   :  { %v2143_v0 = vld [vmem:[%s3498_s0 + $0x8] sm:$0x77]  ;;  %v2148_v1 = vld [vmem:[%s3498_s0] sm:$0x77]  ;;  %s2100_s0 = smov 16   ;;  %s2102_s24 = smov 1  }
   0x2   :  { %73 = vst [vmem:[#allocation1 + $0x10] ss:$2 sm:$0xff] %v2143_v0  ;;  %s2103_s25 = smov 127   ;;  %s2104_s26 = smov 113   ;;  %v2215_v44 = vand.u32 127, %v60_v41  ;;  %vm62_vm0 = vcmp.lt.s32.totalorder %v60_v41, 512 }
   0x3   :  { %71 = vst [vmem:[#allocation1] ss:$2 sm:$0xff] %v2148_v1  ;;  %s2105_s27 = smov 112   ;;  %s2106_s28 = smov 111   ;;  %vm751_vm10 = vcmask 261120   ;;  %vm2001_vm11 = vcmask 1043456  }
   0x4   :  { %24 = vst [vmem:[#allocation2] sm:$0xff] %v2107_v38  ;;  %v97_v46 = vld [vmem:[%s3499_s4] ss:$8 sm:$0xf]  ;;  %vm92_vm1 = vcmp.lt.s32.totalorder %v2215_v44, 17  ;;  %vm220_vm2 = vcmp.lt.s32.totalorder %v2215_v44, 1 }
   0x5   :  { %27 = vst [vmem:[#allocation2 + $0x18] sm:$0xff] %v2107_v38  ;;  %v2225_v47 = vld [vmem:[%s3499_s4 + $0x3] ss:$8 sm:$0xf]  ;;  %v99_v48 = vperm.slane %v97_v46, 0  ;;  %v102_v49 = vperm.slane %v97_v46, 3 }
   0x6   :  { %25 = vst [vmem:[#allocation2 + $0x8] sm:$0xff] %v2107_v38  ;;  %v100_v51 = vperm.slane %v97_v46, 1  ;;  %v101_v52 = vperm.slane %v97_v46, 2  ;;  %v229_v54 = vperm.slane %v2225_v47, 1  ;;  %vm134_vm3 = vcmp.lt.s32.totalorder %v2215_v44, 16 }
   0x7   :  { %26 = vst [vmem:[#allocation2 + $0x10] sm:$0xff] %v2107_v38  ;;  %vm177_vm4 = vcmp.lt.s32.totalorder %v2215_v44, 15  ;;  %vm278_vm5 = vcmp.lt.s32.totalorder %v2215_v44, 127  ;;  %vm364_vm6 = vcmp.lt.s32.totalorder %v2215_v44, 112  ;;  %vm321_vm7 = vcmp.lt.s32.totalorder %v2215_v44, 113 }
   0x8   :  { %28 = vst [vmem:[#allocation2 + $0x20] sm:$0xff] %v2107_v38  ;;  %vm407_vm8 = vcmp.lt.s32.totalorder %v2215_v44, 111 }
   0x9   :  { %v76_v2 = vld.sshfl [vmem:[#allocation1 + $0x10] sm:$0xff pattern:$0x75316420]  ;;  %v77_v3 = vld.sshfl [vmem:[#allocation1 + $0x18] sm:$0xff pattern:$0x75316420] }
   0xa   :  { %86 = vrot.lane.b32.xlu1 %v76_v2, %s2099_s22  ;;  %v74_v4 = vld.sshfl [vmem:[#allocation1] sm:$0xff pattern:$0x75316420]  ;;  %117 = vst [vmem:[#allocation1 + $0x10] ss:$2 sm:$0xff] %v2143_v0 }
   0xb   :  { %82 = vrot.lane.b32.xlu0 %v74_v4, %s2099_s22  ;;  %v75_v5 = vld.sshfl [vmem:[#allocation1 + $0x8] sm:$0xff pattern:$0x75316420]  ;;  %29 = vst [vmem:[#allocation2 + $0x28] sm:$0xff] %v2107_v38 }
   0xc   :  { %115 = vst [vmem:[#allocation1] ss:$2 sm:$0xff] %v2148_v1 }
   0xd   :  { %30 = vst [vmem:[#allocation2 + $0x30] sm:$0xff] %v2107_v38 }
   0xe   :  { %31 = vst [vmem:[#allocation2 + $0x38] sm:$0xff] %v2107_v38 }
   0xf   :  { %32 = vst [vmem:[#allocation2 + $0x40] sm:$0xff] %v2107_v38 }
  0x10   :  { %33 = vst [vmem:[#allocation2 + $0x48] sm:$0xff] %v2107_v38 }
  0x11   :  { %v120_v6 = vld.sshfl [vmem:[#allocation1 + $0x10] sm:$0xff pattern:$0x75316420]  ;;  %v121_v7 = vld.sshfl [vmem:[#allocation1 + $0x18] sm:$0xff pattern:$0x75316420] }
  0x12   :  { %88 = vrot.lane.b32.xlu1 %v77_v3, %s2099_s22  ;;  %130 = vrot.lane.b32.xlu2 %v120_v6, %s2100_s0  ;;  %160 = vst [vmem:[#allocation1 + $0x10] ss:$2 sm:$0xff] %v2143_v0 }
  0x13   :  { %84 = vrot.lane.b32.xlu0 %v75_v5, %s2099_s22  ;;  %v119_v8 = vld.sshfl [vmem:[#allocation1 + $0x8] sm:$0xff pattern:$0x75316420]  ;;  %v2160_v9 = vld.sshfl [vmem:[#allocation1] sm:$0xff pattern:$0x75316420] }
  0x14   :  { %158 = vst [vmem:[#allocation1] ss:$2 sm:$0xff] %v2148_v1 }
  0x15   :  { %34 = vst [vmem:[#allocation2 + $0x50] sm:$0xff] %v2107_v38 }
  0x16   :  { %35 = vst [vmem:[#allocation2 + $0x58] sm:$0xff] %v2107_v38 }
  0x17   :  { %36 = vst [vmem:[#allocation2 + $0x60] sm:$0xff] %v2107_v38 }
  0x18   :  { %37 = vst [vmem:[#allocation2 + $0x68] sm:$0xff] %v2107_v38 }
  0x19   :  { %v164_v10 = vld.sshfl [vmem:[#allocation1 + $0x18] sm:$0xff pattern:$0x75316420]  ;;  %v163_v11 = vld.sshfl [vmem:[#allocation1 + $0x10] sm:$0xff pattern:$0x75316420] }
  0x1a   :  { %128 = vrot.lane.b32.xlu1 %v119_v8, %s2100_s0  ;;  %175 = vrot.lane.b32.xlu2 %v164_v10, %s2101_s23  ;;  %203 = vst [vmem:[#allocation1 + $0x10] ss:$2 sm:$0xff] %v2143_v0 }
  0x1b   :  { %132 = vrot.lane.b32.xlu0 %v121_v7, %s2100_s0  ;;  %v162_v12 = vld.sshfl [vmem:[#allocation1 + $0x8] sm:$0xff pattern:$0x75316420]  ;;  %v161_v13 = vld.sshfl [vmem:[#allocation1] sm:$0xff pattern:$0x75316420] }
  0x1c   :  { %201 = vst [vmem:[#allocation1] ss:$2 sm:$0xff] %v2148_v1 }
  0x1d   :  { %38 = vst [vmem:[#allocation2 + $0x70] sm:$0xff] %v2107_v38 }
  0x1e   :  { %39 = vst [vmem:[#allocation2 + $0x78] sm:$0xff] %v2107_v38 }
  0x1f   :  { %40 = vst [vmem:[#allocation2 + $0x80] sm:$0xff] %v2107_v38 }
  0x20   :  { %41 = vst [vmem:[#allocation2 + $0x88] sm:$0xff] %v2107_v38 }
  0x21   :  { %v207_v14 = vld.sshfl [vmem:[#allocation1 + $0x18] sm:$0xff pattern:$0x75316420]  ;;  %v206_v15 = vld.sshfl [vmem:[#allocation1 + $0x10] sm:$0xff pattern:$0x75316420] }
  0x22   :  { %173 = vrot.lane.b32.xlu1 %v163_v11, %s2101_s23  ;;  %246 = vst [vmem:[#allocation1 + $0x10] ss:$2 sm:$0xff] %v2143_v0 }
  0x23   :  { %171 = vrot.lane.b32.xlu0 %v162_v12, %s2101_s23  ;;  %v205_v16 = vld.sshfl [vmem:[#allocation1 + $0x8] sm:$0xff pattern:$0x75316420]  ;;  %v204_v17 = vld.sshfl [vmem:[#allocation1] sm:$0xff pattern:$0x75316420] }
  0x24   :  { %214 = vrot.lane.b32.xlu2 %v205_v16, %s2102_s24  ;;  %244 = vst [vmem:[#allocation1] ss:$2 sm:$0xff] %v2148_v1 }
  0x25   :  { %42 = vst [vmem:[#allocation2 + $0x90] sm:$0xff] %v2107_v38 }
  0x26   :  { %43 = vst [vmem:[#allocation2 + $0x98] sm:$0xff] %v2107_v38 }
  0x27   :  { %44 = vst [vmem:[#allocation2 + $0xa0] sm:$0xff] %v2107_v38 }
  0x28   :  { %45 = vst [vmem:[#allocation2 + $0xa8] sm:$0xff] %v2107_v38 }
  0x29   :  { %v2173_v18 = vld.sshfl [vmem:[#allocation1 + $0x10] sm:$0xff pattern:$0x75316420]  ;;  %v2175_v19 = vld.sshfl [vmem:[#allocation1 + $0x18] sm:$0xff pattern:$0x75316420] }
  0x2a   :  { %218 = vrot.lane.b32.xlu1 %v207_v14, %s2102_s24  ;;  %261 = vst [vmem:[#allocation1 + $0x10] ss:$2 sm:$0xff] %v2143_v0 }
  0x2b   :  { %216 = vrot.lane.b32.xlu0 %v206_v15, %s2102_s24  ;;  %v2180_v20 = vld.sshfl [vmem:[#allocation1] sm:$0xff pattern:$0x75316420]  ;;  %v2182_v21 = vld.sshfl [vmem:[#allocation1 + $0x8] sm:$0xff pattern:$0x75316420] }
  0x2c   :  { %212 = vrot.lane.b32.xlu2 %v204_v17, %s2102_s24  ;;  %259 = vst [vmem:[#allocation1] ss:$2 sm:$0xff] %v2148_v1 }
  0x2d   :  { %46 = vst [vmem:[#allocation2 + $0xb0] sm:$0xff] %v2107_v38 }
  0x2e   :  { %47 = vst [vmem:[#allocation2 + $0xb8] sm:$0xff] %v2107_v38 }
  0x2f   :  { %48 = vst [vmem:[#allocation2 + $0xc0] sm:$0xff] %v2107_v38 }
  0x30   :  { %49 = vst [vmem:[#allocation2 + $0xc8] sm:$0xff] %v2107_v38 }
  0x31   :  { %v264_v22 = vld.sshfl [vmem:[#allocation1 + $0x10] sm:$0xff pattern:$0x75316420]  ;;  %v265_v23 = vld.sshfl [vmem:[#allocation1 + $0x18] sm:$0xff pattern:$0x75316420] }
  0x32   :  { %304 = vst [vmem:[#allocation1 + $0x10] ss:$2 sm:$0xff] %v2143_v0 }
  0x33   :  { %276 = vrot.lane.b32.xlu0 %v265_v23, %s2103_s25  ;;  %v262_v24 = vld.sshfl [vmem:[#allocation1] sm:$0xff pattern:$0x75316420]  ;;  %v263_v25 = vld.sshfl [vmem:[#allocation1 + $0x8] sm:$0xff pattern:$0x75316420] }
  0x34   :  { %270 = vrot.lane.b32.xlu1 %v262_v24, %s2103_s25  ;;  %274 = vrot.lane.b32.xlu2 %v264_v22, %s2103_s25  ;;  %302 = vst [vmem:[#allocation1] ss:$2 sm:$0xff] %v2148_v1  ;;  %v228_v23 = vperm.slane %v2225_v47, 0  ;;  %v230_v24 = vperm.slane %v2225_v47, 2 }
  0x35   :  { %50 = vst [vmem:[#allocation2 + $0xd0] sm:$0xff] %v2107_v38 }
  0x36   :  { %51 = vst [vmem:[#allocation2 + $0xd8] sm:$0xff] %v2107_v38 }
  0x37   :  { %52 = vst [vmem:[#allocation2 + $0xe0] sm:$0xff] %v2107_v38 }
  0x38   :  { %53 = vst [vmem:[#allocation2 + $0xe8] sm:$0xff] %v2107_v38 }
  0x39   :  { %v308_v26 = vld.sshfl [vmem:[#allocation1 + $0x18] sm:$0xff pattern:$0x75316420]  ;;  %v307_v27 = vld.sshfl [vmem:[#allocation1 + $0x10] sm:$0xff pattern:$0x75316420] }
  0x3a   :  { %347 = vst [vmem:[#allocation1 + $0x10] ss:$2 sm:$0xff] %v2143_v0 }
  0x3b   :  { %319 = vrot.lane.b32.xlu0 %v308_v26, %s2104_s26  ;;  %v306_v28 = vld.sshfl [vmem:[#allocation1 + $0x8] sm:$0xff pattern:$0x75316420]  ;;  %v305_v29 = vld.sshfl [vmem:[#allocation1] sm:$0xff pattern:$0x75316420] }
  0x3c   :  { %272 = vrot.lane.b32.xlu1 %v263_v25, %s2103_s25  ;;  %317 = vrot.lane.b32.xlu2 %v307_v27, %s2104_s26  ;;  %345 = vst [vmem:[#allocation1] ss:$2 sm:$0xff] %v2148_v1  ;;  %v231_v25 = vperm.slane %v2225_v47, 3 }
  0x3d   :  { %54 = vst [vmem:[#allocation2 + $0xf0] sm:$0xff] %v2107_v38 }
  0x3e   :  { %55 = vst [vmem:[#allocation2 + $0xf8] sm:$0xff] %v2107_v38 }
  0x3f   :  { %56 = vst [vmem:[#allocation2 + $0x100] sm:$0xff] %v2107_v38 }
  0x40   :  { %57 = vst [vmem:[#allocation2 + $0x108] sm:$0xff] %v2107_v38 }
  0x41   :  { %v350_v30 = vld.sshfl [vmem:[#allocation1 + $0x10] sm:$0xff pattern:$0x75316420]  ;;  %v351_v31 = vld.sshfl [vmem:[#allocation1 + $0x18] sm:$0xff pattern:$0x75316420] }
  0x42   :  { %390 = vst [vmem:[#allocation1 + $0x10] ss:$2 sm:$0xff] %v2143_v0 }
  0x43   :  { %315 = vrot.lane.b32.xlu0 %v306_v28, %s2104_s26  ;;  %v348_v32 = vld.sshfl [vmem:[#allocation1] sm:$0xff pattern:$0x75316420]  ;;  %v349_v33 = vld.sshfl [vmem:[#allocation1 + $0x8] sm:$0xff pattern:$0x75316420] }
  0x44   :  { %313 = vrot.lane.b32.xlu1 %v305_v29, %s2104_s26  ;;  %360 = vrot.lane.b32.xlu2 %v350_v30, %s2105_s27  ;;  %388 = vst [vmem:[#allocation1] ss:$2 sm:$0xff] %v2148_v1  ;;  %v2245_v1 = vld [vmem:[%s3499_s4 + $0x1] ss:$8 sm:$0xf] }
  0x45   :  { %58 = vst [vmem:[#allocation2 + $0x110] sm:$0xff] %v2107_v38  ;;  %v144_v4 = vperm.slane %v2245_v1, 2  ;;  %v145_v5 = vperm.slane %v2245_v1, 3 }
  0x46   :  { %59 = vst [vmem:[#allocation2 + $0x118] sm:$0xff] %v2107_v38 }
  0x47   :  { %65 = vst.msk [vmem:[#allocation2 + $0x3] ss:$8 sm:$0xf] %vm62_vm0, %v2108_v50  ;;  %v2016_v50 = vld [vmem:[%s3499_s4 + $0x6] ss:$8 sm:$0xf] }
  0x48   :  { %255 = vst [vmem:[#allocation2 + $0x80] sm:$0x7] %v2180_v20 }
  0x49   :  { %v394_v34 = vld.sshfl [vmem:[#allocation1 + $0x18] sm:$0xff pattern:$0x75316420]  ;;  %v393_v37 = vld.sshfl [vmem:[#allocation1 + $0x10] sm:$0xff pattern:$0x75316420] }
  0x4a   :  { %256 = vst [vmem:[#allocation2 + $0x88] sm:$0x7] %v2182_v21 }
  0x4b   :  { %362 = vrot.lane.b32.xlu0 %v351_v31, %s2105_s27  ;;  %v392_v35 = vld.sshfl [vmem:[#allocation1 + $0x8] sm:$0xff pattern:$0x75316420]  ;;  %v391_v36 = vld.sshfl [vmem:[#allocation1] sm:$0xff pattern:$0x75316420] }
  0x4c   :  { %356 = vrot.lane.b32.xlu1 %v348_v32, %s2105_s27  ;;  %358 = vrot.lane.b32.xlu2 %v349_v33, %s2105_s27  ;;  %257 = vst [vmem:[#allocation2 + $0x90] sm:$0x7] %v2173_v18 }
  0x4d   :  { %258 = vst [vmem:[#allocation2 + $0x98] sm:$0x7] %v2175_v19 }
  0x53   :  { %405 = vrot.lane.b32.xlu0 %v394_v34, %s2106_s28 }
  0x54   :  { %401 = vrot.lane.b32.xlu1 %v392_v35, %s2106_s28  ;;  %399 = vrot.lane.b32.xlu2 %v391_v36, %s2106_s28  ;;  %v2015_v35 = vld [vmem:[%s3499_s4 + $0x5] ss:$8 sm:$0xf]  ;;  %v2017_v36 = vld [vmem:[%s3499_s4 + $0x7] ss:$8 sm:$0xf] }
  0x55   :  { %v289_v38 = vperm.slane %v2015_v35, 3 }
  0x5b   :  { %169 = vrot.lane.b32.xlu0 %v161_v13, %s2101_s23  ;;  %v2268_v13 = vld [vmem:[%s3499_s4 + $0x2] ss:$8 sm:$0xf] }
  0x5c   :  { %126 = vrot.lane.b32.xlu1 %v2160_v9, %s2100_s0  ;;  %403 = vrot.lane.b32.xlu2 %v393_v37, %s2106_s28  ;;  %v188_v14 = vperm.slane %v2268_v13, 3  ;;  %v187_v15 = vperm.slane %v2268_v13, 2  ;;  %v288_v37 = vperm.slane %v2015_v35, 2 }
  0x6c   :  { %v2211_v39 = vpop.permute.xlu2 %130 }
  0x74   :  { %v2213_v40 = vpop.permute.xlu2 %175 }
  0x7c   :  { %v87_v42 = vpop.permute.xlu1 %86 }
  0x7d   :  { %v83_v43 = vpop.permute.xlu0 %82 }
  0x7e   :  { %v2217_v45 = vpop.permute.xlu2 %214 }
  0x84   :  { %v89_v53 = vpop.permute.xlu1 %88 }
  0x85   :  { %v93_v55 = vsel %vm92_vm1, %v87_v42, %v89_v53  ;;  %v96_v56 = vsel %vm92_vm1, %v89_v53, %v83_v43  ;;  %v85_v57 = vpop.permute.xlu0 %84  ;;  %v286_v53 = vperm.slane %v2015_v35, 0 }
  0x86   :  { %v107_v58 = vmul.f32 %v99_v48, %v96_v56  ;;  %v110_v59 = vmul.f32 %v102_v49, %v93_v55  ;;  %v94_v60 = vsel %vm92_vm1, %v85_v57, %v87_v42  ;;  %v95_v61 = vsel %vm92_vm1, %v83_v43, %v85_v57  ;;  %v213_v62 = vpop.permute.xlu2 %212 }
  0x87   :  { %v108_v63 = vmul.f32 %v100_v51, %v95_v61  ;;  %v109_v0 = vmul.f32 %v101_v52, %v94_v60  ;;  %v223_v2 = vsel %vm220_vm2, %v213_v62, %v2217_v45  ;;  %v331_v52 = vperm.slane %v2016_v50, 2 }
  0x88   :  { %111 = vst [vmem:[#allocation2] sm:$0x7] %v107_v58  ;;  %v237_v3 = vmul.f32 %v229_v54, %v223_v2  ;;  %v287_v54 = vperm.slane %v2015_v35, 1  ;;  %v332_v2 = vperm.slane %v2016_v50, 3 }
  0x89   :  { %114 = vst [vmem:[#allocation2 + $0x18] sm:$0x7] %v110_v59 }
  0x8a   :  { %112 = vst [vmem:[#allocation2 + $0x8] sm:$0x7] %v108_v63  ;;  %v330_v63 = vperm.slane %v2016_v50, 1 }
  0x8b   :  { %113 = vst [vmem:[#allocation2 + $0x10] sm:$0x7] %v109_v0  ;;  %v329_v0 = vperm.slane %v2016_v50, 0 }
  0x8c   :  { %v2253_v6 = vpop.permute.xlu1 %128  ;;  %241 = vst [vmem:[#allocation2 + $0x68] sm:$0x7] %v237_v3 }
  0x8d   :  { %v2255_v7 = vpop.permute.xlu0 %132  ;;  %v136_v8 = vsel %vm134_vm3, %v2253_v6, %v2211_v39 }
  0x8e   :  { %v135_v9 = vsel %vm134_vm3, %v2211_v39, %v2255_v7  ;;  %v152_v10 = vmul.f32 %v144_v4, %v136_v8  ;;  %v275_v11 = vpop.permute.xlu2 %274  ;;  %v373_v39 = vperm.slane %v2017_v36, 1 }
  0x8f   :  { %v153_v12 = vmul.f32 %v145_v5, %v135_v9 }
  0x90   :  { %156 = vst [vmem:[#allocation2 + $0x30] sm:$0x7] %v152_v10 }
  0x91   :  { %157 = vst [vmem:[#allocation2 + $0x38] sm:$0x7] %v153_v12 }
  0x94   :  { %v174_v16 = vpop.permute.xlu1 %173 }
  0x95   :  { %v178_v17 = vsel %vm177_vm4, %v174_v16, %v2213_v40  ;;  %v2276_v18 = vpop.permute.xlu0 %171 }
  0x96   :  { %v196_v19 = vmul.f32 %v188_v14, %v178_v17  ;;  %v179_v20 = vsel %vm177_vm4, %v2276_v18, %v174_v16  ;;  %v318_v21 = vpop.permute.xlu2 %317  ;;  %v372_v16 = vperm.slane %v2017_v36, 0  ;;  %v375_v17 = vperm.slane %v2017_v36, 3 }
  0x97   :  { %v195_v22 = vmul.f32 %v187_v15, %v179_v20  ;;  %v374_v15 = vperm.slane %v2017_v36, 2 }
  0x98   :  { %200 = vst [vmem:[#allocation2 + $0x58] sm:$0x7] %v196_v19 }
  0x99   :  { %199 = vst [vmem:[#allocation2 + $0x50] sm:$0x7] %v195_v22 }
  0x9c   :  { %v219_v26 = vpop.permute.xlu1 %218 }
  0x9d   :  { %v224_v27 = vsel %vm220_vm2, %v219_v26, %v213_v62  ;;  %v217_v28 = vpop.permute.xlu0 %216 }
  0x9e   :  { %v236_v29 = vmul.f32 %v228_v23, %v224_v27  ;;  %v221_v30 = vsel %vm220_vm2, %v217_v28, %v219_v26  ;;  %v222_v31 = vsel %vm220_vm2, %v2217_v45, %v217_v28  ;;  %v361_v32 = vpop.permute.xlu2 %360  ;;  %v2018_v27 = vld [vmem:[%s3499_s4 + $0x20] ss:$8 sm:$0xf] }
  0x9f   :  { %v238_v33 = vmul.f32 %v230_v24, %v222_v31  ;;  %v239_v34 = vmul.f32 %v231_v25, %v221_v30  ;;  %v418_v28 = vperm.slane %v2018_v27, 3  ;;  %v415_v30 = vperm.slane %v2018_v27, 0 }
  0xa0   :  { %240 = vst [vmem:[#allocation2 + $0x60] sm:$0x7] %v236_v29  ;;  %v416_v31 = vperm.slane %v2018_v27, 1 }
  0xa1   :  { %242 = vst [vmem:[#allocation2 + $0x70] sm:$0x7] %v238_v33 }
  0xa2   :  { %243 = vst [vmem:[#allocation2 + $0x78] sm:$0x7] %v239_v34 }
  0xa5   :  { %v277_v41 = vpop.permute.xlu0 %276 }
  0xa6   :  { %v279_v42 = vsel %vm278_vm5, %v275_v11, %v277_v41  ;;  %v271_v43 = vpop.permute.xlu1 %270  ;;  %v359_v45 = vpop.permute.xlu2 %358 }
  0xa7   :  { %v296_v46 = vmul.f32 %v288_v37, %v279_v42  ;;  %v282_v47 = vsel %vm278_vm5, %v277_v41, %v271_v43  ;;  %v366_v48 = vsel %vm364_vm6, %v359_v45, %v361_v32 }
  0xa8   :  { %v297_v49 = vmul.f32 %v289_v38, %v282_v47  ;;  %v381_v51 = vmul.f32 %v373_v39, %v366_v48  ;;  %v142_v47 = vperm.slane %v2245_v1, 0  ;;  %v143_v48 = vperm.slane %v2245_v1, 1 }
  0xa9   :  { %300 = vst [vmem:[#allocation2 + $0xb0] sm:$0x7] %v296_v46  ;;  %v186_v46 = vperm.slane %v2268_v13, 1 }
  0xaa   :  { %301 = vst [vmem:[#allocation2 + $0xb8] sm:$0x7] %v297_v49 }
  0xab   :  { %385 = vst [vmem:[#allocation2 + $0xe8] sm:$0x7] %v381_v51 }
  0xad   :  { %v320_v55 = vpop.permute.xlu0 %319 }
  0xae   :  { %v322_v56 = vsel %vm321_vm7, %v318_v21, %v320_v55  ;;  %v273_v57 = vpop.permute.xlu1 %272  ;;  %v400_v14 = vpop.permute.xlu2 %399 }
  0xaf   :  { %v339_v58 = vmul.f32 %v331_v52, %v322_v56  ;;  %v280_v59 = vsel %vm278_vm5, %v273_v57, %v275_v11  ;;  %v281_v60 = vsel %vm278_vm5, %v271_v43, %v273_v57 }
  0xb0   :  { %v294_v61 = vmul.f32 %v286_v53, %v281_v60  ;;  %v295_v62 = vmul.f32 %v287_v54, %v280_v59 }
  0xb1   :  { %343 = vst [vmem:[#allocation2 + $0xd0] sm:$0x7] %v339_v58 }
  0xb2   :  { %298 = vst [vmem:[#allocation2 + $0xa0] sm:$0x7] %v294_v61 }
  0xb3   :  { %299 = vst [vmem:[#allocation2 + $0xa8] sm:$0x7] %v295_v62 }
  0xb5   :  { %v316_v3 = vpop.permute.xlu0 %315 }
  0xb6   :  { %v323_v4 = vsel %vm321_vm7, %v316_v3, %v318_v21  ;;  %v314_v5 = vpop.permute.xlu1 %313  ;;  %v404_v29 = vpop.permute.xlu2 %403 }
  0xb7   :  { %v338_v8 = vmul.f32 %v330_v63, %v323_v4  ;;  %v324_v9 = vsel %vm321_vm7, %v314_v5, %v316_v3  ;;  %v325_v10 = vsel %vm321_vm7, %v320_v55, %v314_v5  ;;  %v451_v5 = vld [vmem:[#allocation2 + $0x80] sm:$0xff] }
  0xb8   :  { %v337_v11 = vmul.f32 %v329_v0, %v324_v9  ;;  %v340_v12 = vmul.f32 %v332_v2, %v325_v10  ;;  %v458_v0 = vld [vmem:[#allocation2 + $0xb8] sm:$0xff]  ;;  %v461_v3 = vld [vmem:[#allocation2 + $0xd0] sm:$0xff]  ;;  %v452_v9 = vld [vmem:[#allocation2 + $0x88] sm:$0xff] }
  0xb9   :  { %342 = vst [vmem:[#allocation2 + $0xc8] sm:$0x7] %v338_v8  ;;  %v454_v2 = vld [vmem:[#allocation2 + $0x98] sm:$0xff]  ;;  %v455_v4 = vld [vmem:[#allocation2 + $0xa0] sm:$0xff]  ;;  %v457_v10 = vld [vmem:[#allocation2 + $0xb0] sm:$0xff] }
  0xba   :  { %341 = vst [vmem:[#allocation2 + $0xc0] sm:$0x7] %v337_v11  ;;  %v456_v8 = vld [vmem:[#allocation2 + $0xa8] sm:$0xff]  ;;  %v453_v11 = vld [vmem:[#allocation2 + $0x90] sm:$0xff] }
  0xbb   :  { %344 = vst [vmem:[#allocation2 + $0xd8] sm:$0x7] %v340_v12  ;;  %v450_v12 = vld [vmem:[#allocation2 + $0x78] sm:$0xff] }
  0xbd   :  { %v363_v19 = vpop.permute.xlu0 %362 }
  0xbe   :  { %v365_v20 = vsel %vm364_vm6, %v361_v32, %v363_v19  ;;  %v357_v21 = vpop.permute.xlu1 %356  ;;  %v417_v32 = vperm.slane %v2018_v27, 2  ;;  %v441_v27 = vld [vmem:[#allocation2 + $0x30] sm:$0xff] }
  0xbf   :  { %v382_v22 = vmul.f32 %v374_v15, %v365_v20  ;;  %v367_v23 = vsel %vm364_vm6, %v357_v21, %v359_v45  ;;  %v368_v24 = vsel %vm364_vm6, %v363_v19, %v357_v21  ;;  %v185_v45 = vperm.slane %v2268_v13, 0  ;;  %v448_v15 = vld [vmem:[#allocation2 + $0x68] sm:$0xff]  ;;  %v442_v21 = vld [vmem:[#allocation2 + $0x38] sm:$0xff] }
  0xc0   :  { %v380_v25 = vmul.f32 %v372_v16, %v367_v23  ;;  %v383_v26 = vmul.f32 %v375_v17, %v368_v24  ;;  %v460_v63 = vld [vmem:[#allocation2 + $0xc8] sm:$0xff]  ;;  %v446_v16 = vld [vmem:[#allocation2 + $0x58] sm:$0xff]  ;;  %v449_v17 = vld [vmem:[#allocation2 + $0x70] sm:$0xff] }
  0xc1   :  { %386 = vst [vmem:[#allocation2 + $0xf0] sm:$0x7] %v382_v22  ;;  %v459_v62 = vld [vmem:[#allocation2 + $0xc0] sm:$0xff]  ;;  %v445_v22 = vld [vmem:[#allocation2 + $0x50] sm:$0xff] }
  0xc2   :  { %384 = vst [vmem:[#allocation2 + $0xe0] sm:$0x7] %v380_v25  ;;  %v438_v25 = vld [vmem:[#allocation2 + $0x18] sm:$0xff] }
  0xc3   :  { %387 = vst [vmem:[#allocation2 + $0xf8] sm:$0x7] %v383_v26  ;;  %v431_v26 = vld [vmem:[%s3500_s1] sm:$0xff] }
  0xc5   :  { %v406_v33 = vpop.permute.xlu0 %405 }
  0xc6   :  { %v411_v34 = vsel %vm407_vm8, %v406_v33, %v400_v14  ;;  %v402_v35 = vpop.permute.xlu1 %401  ;;  %v408_v36 = vsel %vm407_vm8, %v404_v29, %v406_v33 }
  0xc7   :  { %v426_v37 = vmul.f32 %v418_v28, %v411_v34  ;;  %v410_v38 = vsel %vm407_vm8, %v400_v14, %v402_v35  ;;  %v409_v39 = vsel %vm407_vm8, %v402_v35, %v404_v29  ;;  %v425_v43 = vmul.f32 %v417_v32, %v408_v36  ;;  %v447_v14 = vld [vmem:[#allocation2 + $0x60] sm:$0xff]  ;;  %v436_v29 = vld [vmem:[#allocation2 + $0x8] sm:$0xff] }
  0xc8   :  { %v423_v41 = vmul.f32 %v415_v30, %v410_v38  ;;  %v424_v42 = vmul.f32 %v416_v31, %v409_v39  ;;  %v465_v61 = vld [vmem:[#allocation2 + $0xf0] sm:$0xff]  ;;  %v435_v28 = vld [vmem:[#allocation2] sm:$0xff]  ;;  %v433_v32 = vld [vmem:[%s3500_s1 + $0x10] sm:$0xff] }
  0xc9   :  { %430 = vst [vmem:[#allocation2 + $0x118] sm:$0x7] %v426_v37  ;;  %v463_v60 = vld [vmem:[#allocation2 + $0xe0] sm:$0xff]  ;;  %v437_v30 = vld [vmem:[#allocation2 + $0x10] sm:$0xff] }
  0xca   :  { %427 = vst [vmem:[#allocation2 + $0x100] sm:$0x7] %v423_v41  ;;  %v466_v58 = vld [vmem:[#allocation2 + $0xf8] sm:$0xff]  ;;  %v432_v31 = vld [vmem:[%s3500_s1 + $0x8] sm:$0xff]  ;;  %v434_v37 = vld [vmem:[%s3500_s1 + $0x18] sm:$0xff] }
  0xcb   :  { %428 = vst [vmem:[#allocation2 + $0x108] sm:$0x7] %v424_v42 }
  0xcc   :  { %429 = vst [vmem:[#allocation2 + $0x110] sm:$0x7] %v425_v43 }
  0xcd   :  { %v170_v49 = vpop.permute.xlu0 %169 }
  0xce   :  { %v180_v50 = vsel %vm177_vm4, %v170_v49, %v2276_v18  ;;  %v181_v51 = vsel %vm177_vm4, %v2213_v40, %v170_v49  ;;  %v127_v52 = vpop.permute.xlu1 %126 }
  0xcf   :  { %v193_v53 = vmul.f32 %v185_v45, %v181_v51  ;;  %v194_v54 = vmul.f32 %v186_v46, %v180_v50  ;;  %v137_v13 = vsel %vm134_vm3, %v127_v52, %v2253_v6  ;;  %v138_v1 = vsel %vm134_vm3, %v2255_v7, %v127_v52  ;;  %v464_v6 = vld [vmem:[#allocation2 + $0xe8] sm:$0xff]  ;;  %v462_v7 = vld [vmem:[#allocation2 + $0xd8] sm:$0xff] }
  0xd0   :  { %v150_v55 = vmul.f32 %v142_v47, %v138_v1  ;;  %v151_v56 = vmul.f32 %v143_v48, %v137_v13  ;;  %v470_v57 = vld [vmem:[#allocation2 + $0x118] sm:$0xff] }
  0xd1   :  { %197 = vst [vmem:[#allocation2 + $0x40] sm:$0x7] %v193_v53  ;;  %v467_v18 = vld [vmem:[#allocation2 + $0x100] sm:$0xff]  ;;  %578 = vmatpush.msra.mxu3 %v470_v57 }
  0xd2   :  { %198 = vst [vmem:[#allocation2 + $0x48] sm:$0x7] %v194_v54  ;;  %491 = vmatpush.msra.mxu0 %v467_v18  ;;  %v468_v40 = vld [vmem:[#allocation2 + $0x108] sm:$0xff] }
  0xd3   :  { %154 = vst [vmem:[#allocation2 + $0x20] sm:$0x7] %v150_v55  ;;  %520 = vmatpush.msra.mxu1 %v468_v40  ;;  %v469_v59 = vld [vmem:[#allocation2 + $0x110] sm:$0xff]  ;;  %579 = vmatpush.msra.mxu3 %v466_v58 }
  0xd4   :  { %155 = vst [vmem:[#allocation2 + $0x28] sm:$0x7] %v151_v56  ;;  %549 = vmatpush.msra.mxu2 %v469_v59  ;;  %492 = vmatpush.msra.mxu0 %v463_v60 }
  0xd5   :  { %521 = vmatpush.msra.mxu1 %v464_v6  ;;  %580 = vmatpush.msra.mxu3 %v462_v7 }
  0xd6   :  { %550 = vmatpush.msra.mxu2 %v465_v61  ;;  %493 = vmatpush.msra.mxu0 %v459_v62 }
  0xd7   :  { %522 = vmatpush.msra.mxu1 %v460_v63  ;;  %581 = vmatpush.msra.mxu3 %v458_v0 }
  0xd8   :  { %551 = vmatpush.msra.mxu2 %v461_v3  ;;  %494 = vmatpush.msra.mxu0 %v455_v4  ;;  %v443_v19 = vld [vmem:[#allocation2 + $0x40] sm:$0xff] }
  0xd9   :  { %523 = vmatpush.msra.mxu1 %v456_v8  ;;  %582 = vmatpush.msra.mxu3 %v454_v2  ;;  %v444_v20 = vld [vmem:[#allocation2 + $0x48] sm:$0xff] }
  0xda   :  { %552 = vmatpush.msra.mxu2 %v457_v10  ;;  %495 = vmatpush.msra.mxu0 %v451_v5  ;;  %v439_v23 = vld [vmem:[#allocation2 + $0x20] sm:$0xff] }
  0xdb   :  { %524 = vmatpush.msra.mxu1 %v452_v9  ;;  %583 = vmatpush.msra.mxu3 %v450_v12  ;;  %v440_v24 = vld [vmem:[#allocation2 + $0x28] sm:$0xff] }
  0xdc   :  { %553 = vmatpush.msra.mxu2 %v453_v11  ;;  %496 = vmatpush.msra.mxu0 %v447_v14 }
  0xdd   :  { %525 = vmatpush.msra.mxu1 %v448_v15  ;;  %584 = vmatpush.msra.mxu3 %v446_v16 }
  0xde   :  { %554 = vmatpush.msra.mxu2 %v449_v17  ;;  %497 = vmatpush.msra.mxu0 %v443_v19 }
  0xdf   :  { %526 = vmatpush.msra.mxu1 %v444_v20  ;;  %585 = vmatpush.msra.mxu3 %v442_v21 }
  0xe0   :  { %555 = vmatpush.msra.mxu2 %v445_v22  ;;  %498 = vmatpush.msra.mxu0 %v439_v23 }
  0xe1   :  { %527 = vmatpush.msra.mxu1 %v440_v24  ;;  %586 = vmatpush.msra.mxu3 %v438_v25 }
  0xe2   :  { %556 = vmatpush.msra.mxu2 %v441_v27  ;;  %499 = vmatpush.msra.mxu0 %v435_v28 }
  0xe3   :  { %528 = vmatpush.msra.mxu1 %v436_v29  ;;  %2019 = vmatmul.msk.f32.vlgmr.msra.gmra.mxu0 %vm471_vm9, %v431_v26 }
  0xe4   :  { %557 = vmatpush.msra.mxu2 %v437_v30  ;;  %2023 = vmatmul.msk.f32.vlgmr.msra.gmra.mxu1 %vm471_vm9, %v431_v26 }
  0xe5   :  { %2027 = vmatmul.msk.f32.vlgmr.msra.gmra.mxu2 %vm471_vm9, %v431_v26  ;;  %2031 = vmatmul.msk.f32.vlgmr.msra.gmra.mxu3 %vm471_vm9, %v431_v26 }
  0xeb   :  { %2020 = vmatmul.msk.f32.gmra.mxu0 %vm471_vm9, %v432_v31 }
  0xec   :  { %2024 = vmatmul.msk.f32.gmra.mxu1 %vm471_vm9, %v432_v31 }
  0xed   :  { %2032 = vmatmul.msk.f32.gmra.mxu3 %vm471_vm9, %v432_v31  ;;  %2028 = vmatmul.msk.f32.gmra.mxu2 %vm471_vm9, %v432_v31 }
  0xf3   :  { %2021 = vmatmul.msk.f32.gmra.mxu0 %vm471_vm9, %v433_v32 }
  0xf4   :  { %2025 = vmatmul.msk.f32.gmra.mxu1 %vm471_vm9, %v433_v32 }
  0xf5   :  { %2029 = vmatmul.msk.f32.gmra.mxu2 %vm471_vm9, %v433_v32  ;;  %2033 = vmatmul.msk.f32.gmra.mxu3 %vm471_vm9, %v433_v32 }
  0xfb   :  { %2022 = vmatmul.msk.f32.gmra.mxu0 %vm471_vm9, %v434_v37 }
  0xfc   :  { %2026 = vmatmul.msk.f32.gmra.mxu1 %vm471_vm9, %v434_v37 }
  0xfd   :  { %2030 = vmatmul.msk.f32.gmra.mxu2 %vm471_vm9, %v434_v37  ;;  %2034 = vmatmul.msk.f32.gmra.mxu3 %vm471_vm9, %v434_v37 }
 0x160   :  { %v2376_v33 = vpop.f32.mrf.mxu0 }
 0x161   :  { %3518 = vst [vmem:[#allocation3_spill] sm:$0xff] %v2376_v33  ;;  %v2378_v34 = vpop.f32.mrf.mxu1  ;;  %600 = vrot.lane.b32.xlu2 %v2376_v33, %s2099_s22 }
 0x162   :  { %683 = vrot.lane.b32.xlu1 %v2378_v34, %s2100_s0  ;;  %608 = vrot.lane.b32.xlu0 %v2378_v34, %s2099_s22 }
 0x168   :  { %v2392_v35 = vpop.f32.mrf.mxu2  ;;  %v2400_v36 = vpop.f32.mrf.mxu3 }
 0x169   :  { %926 = vrot.lane.b32.xlu2 %v2378_v34, %s2101_s23  ;;  %3519 = vst [vmem:[#allocation4_spill] sm:$0xff] %v2400_v36  ;;  %v2427_v38 = vpop.f32.mrf.mxu1  ;;  %v2435_v39 = vpop.f32.mrf.mxu0 }
 0x16a   :  { %918 = vrot.lane.b32.xlu1 %v2376_v33, %s2101_s23  ;;  %675 = vrot.lane.b32.xlu0 %v2376_v33, %s2100_s0  ;;  %3520 = vst [vmem:[#allocation5_spill] sm:$0xff] %v2435_v39 }
 0x170   :  { %v2461_v41 = vpop.f32.mrf.mxu3  ;;  %v2469_v43 = vpop.f32.mrf.mxu2 }
 0x171   :  { %1081 = vrot.lane.b32.xlu2 %v2376_v33, %s2102_s24  ;;  %3521 = vst [vmem:[#allocation6_spill] sm:$0xff] %v2461_v41  ;;  %v2495_v51 = vpop.f32.mrf.mxu0  ;;  %v2497_v52 = vpop.f32.mrf.mxu1 }
 0x172   :  { %616 = vrot.lane.b32.xlu1 %v2392_v35, %s2099_s22  ;;  %1089 = vrot.lane.b32.xlu0 %v2378_v34, %s2102_s24  ;;  %3522 = vst [vmem:[#allocation7_spill] sm:$0xff] %v2469_v43 }
 0x173   :  { %3523 = vst [vmem:[#allocation8_spill] sm:$0xff] %v2495_v51 }
 0x178   :  { %v2576_v11 = vpop.f32.mrf.mxu2  ;;  %v2604_v22 = vpop.f32.mrf.mxu3 }
 0x179   :  { %1333 = vrot.lane.b32.xlu2 %v2376_v33, %s2103_s25  ;;  %3533 = vst [vmem:[#allocation18_spill] sm:$0xff] %v2604_v22 }
 0x17a   :  { %942 = vrot.lane.b32.xlu1 %v2400_v36, %s2101_s23  ;;  %1496 = vrot.lane.b32.xlu0 %v2376_v33, %s2104_s26 }
 0x181   :  { %1341 = vrot.lane.b32.xlu2 %v2378_v34, %s2103_s25 }
 0x182   :  { %1097 = vrot.lane.b32.xlu1 %v2392_v35, %s2102_s24  ;;  %1504 = vrot.lane.b32.xlu0 %v2378_v34, %s2104_s26 }
 0x189   :  { %624 = vrot.lane.b32.xlu2 %v2400_v36, %s2099_s22 }
 0x18a   :  { %1349 = vrot.lane.b32.xlu1 %v2392_v35, %s2103_s25  ;;  %699 = vrot.lane.b32.xlu0 %v2400_v36, %s2100_s0 }
 0x191   :  { %691 = vrot.lane.b32.xlu2 %v2392_v35, %s2100_s0 }
 0x192   :  { %610 = vrot.lane.b32.xlu1 %v2427_v38, %s2099_s22  ;;  %934 = vrot.lane.b32.xlu0 %v2392_v35, %s2101_s23 }
 0x199   :  { %1105 = vrot.lane.b32.xlu2 %v2400_v36, %s2102_s24 }
 0x19a   :  { %1520 = vrot.lane.b32.xlu0 %v2400_v36, %s2104_s26  ;;  %677 = vrot.lane.b32.xlu1 %v2435_v39, %s2100_s0 }
 0x1a1   :  { %1357 = vrot.lane.b32.xlu2 %v2400_v36, %s2103_s25 }
 0x1a2   :  { %1091 = vrot.lane.b32.xlu1 %v2427_v38, %s2102_s24  ;;  %602 = vrot.lane.b32.xlu0 %v2435_v39, %s2099_s22 }
 0x1a9   :  { %1512 = vrot.lane.b32.xlu2 %v2392_v35, %s2104_s26 }
 0x1aa   :  { %1343 = vrot.lane.b32.xlu1 %v2427_v38, %s2103_s25  ;;  %928 = vrot.lane.b32.xlu0 %v2427_v38, %s2101_s23 }
 0x1b1   :  { %685 = vrot.lane.b32.xlu2 %v2427_v38, %s2100_s0 }
 0x1b2   :  { %1661 = vrot.lane.b32.xlu1 %v2435_v39, %s2105_s27  ;;  %1083 = vrot.lane.b32.xlu0 %v2435_v39, %s2102_s24 }
 0x1b9   :  { %920 = vrot.lane.b32.xlu2 %v2435_v39, %s2101_s23 }
 0x1ba   :  { %701 = vrot.lane.b32.xlu1 %v2461_v41, %s2100_s0  ;;  %1498 = vrot.lane.b32.xlu0 %v2435_v39, %s2104_s26 }
 0x1bb   :  { %v601_v42 = vpop.permute.xlu2 %600 }
 0x1c1   :  { %1335 = vrot.lane.b32.xlu2 %v2435_v39, %s2103_s25 }
 0x1c2   :  { %936 = vrot.lane.b32.xlu1 %v2469_v43, %s2101_s23  ;;  %626 = vrot.lane.b32.xlu0 %v2461_v41, %s2099_s22 }
 0x1c3   :  { %v2477_v45 = vpop.permute.xlu2 %926 }
 0x1c9   :  { %1506 = vrot.lane.b32.xlu2 %v2427_v38, %s2104_s26 }
 0x1ca   :  { %1359 = vrot.lane.b32.xlu1 %v2461_v41, %s2103_s25  ;;  %693 = vrot.lane.b32.xlu0 %v2469_v43, %s2100_s0 }
 0x1cb   :  { %v1082_v46 = vpop.permute.xlu2 %1081 }
 0x1d1   :  { %618 = vrot.lane.b32.xlu2 %v2469_v43, %s2099_s22 }
 0x1d2   :  { %1351 = vrot.lane.b32.xlu1 %v2469_v43, %s2103_s25  ;;  %1107 = vrot.lane.b32.xlu0 %v2461_v41, %s2102_s24 }
 0x1d3   :  { %v1334_v47 = vpop.permute.xlu2 %1333 }
 0x1d4   :  { %v684_v48 = vpop.permute.xlu1 %683  ;;  %v609_v49 = vpop.permute.xlu0 %608 }
 0x1d5   :  { %v2493_v50 = vsel %vm92_vm1, %v601_v42, %v609_v49 }
 0x1d9   :  { %944 = vrot.lane.b32.xlu2 %v2461_v41, %s2101_s23 }
 0x1da   :  { %687 = vrot.lane.b32.xlu0 %v2497_v52, %s2100_s0  ;;  %604 = vrot.lane.b32.xlu1 %v2495_v51, %s2099_s22 }
 0x1db   :  { %v1342_v53 = vpop.permute.xlu2 %1341 }
 0x1dc   :  { %v919_v54 = vpop.permute.xlu1 %918  ;;  %v676_v13 = vpop.permute.xlu0 %675  ;;  %v2507_v1 = vsel %vm278_vm5, %v1334_v47, %v1342_v53 }
 0x1dd   :  { %3524 = vst [vmem:[#allocation9_spill] sm:$0xff] %v2507_v1  ;;  %v2512_v55 = vsel %vm177_vm4, %v919_v54, %v2477_v45  ;;  %v2516_v56 = vsel %vm134_vm3, %v676_v13, %v684_v48 }
 0x1e1   :  { %1099 = vrot.lane.b32.xlu2 %v2469_v43, %s2102_s24 }
 0x1e2   :  { %922 = vrot.lane.b32.xlu0 %v2495_v51, %s2101_s23  ;;  %930 = vrot.lane.b32.xlu1 %v2497_v52, %s2101_s23 }
 0x1e3   :  { %v625_v57 = vpop.permute.xlu2 %624 }
 0x1e4   :  { %v617_v18 = vpop.permute.xlu1 %616  ;;  %v1090_v40 = vpop.permute.xlu0 %1089  ;;  %v2526_v58 = vsel %vm92_vm1, %v625_v57, %v601_v42 }
 0x1e5   :  { %v2530_v59 = vsel %vm92_vm1, %v609_v49, %v617_v18  ;;  %v2534_v60 = vsel %vm220_vm2, %v1082_v46, %v1090_v40  ;;  %v2538_v6 = vsel %vm92_vm1, %v617_v18, %v625_v57  ;;  %v2653_v49 = vpop.f32.mrf.mxu1 }
 0x1e9   :  { %1522 = vrot.lane.b32.xlu2 %v2461_v41, %s2104_s26 }
 0x1ea   :  { %1345 = vrot.lane.b32.xlu0 %v2497_v52, %s2103_s25  ;;  %1085 = vrot.lane.b32.xlu1 %v2495_v51, %s2102_s24 }
 0x1eb   :  { %v692_v7 = vpop.permute.xlu2 %691 }
 0x1ec   :  { %v943_v61 = vpop.permute.xlu1 %942  ;;  %v1497_v62 = vpop.permute.xlu0 %1496  ;;  %v2548_v63 = vsel %vm134_vm3, %v684_v48, %v692_v7 }
 0x1ed   :  { %v2552_v0 = vsel %vm177_vm4, %v943_v61, %v919_v54 }
 0x1ee   :  { %3525 = vst [vmem:[#allocation10_spill] sm:$0xff] %v2552_v0 }
 0x1f1   :  { %1514 = vrot.lane.b32.xlu2 %v2469_v43, %s2104_s26 }
 0x1f2   :  { %1663 = vrot.lane.b32.xlu0 %v2495_v51, %s2105_s27  ;;  %1093 = vrot.lane.b32.xlu1 %v2497_v52, %s2102_s24 }
 0x1f3   :  { %v1106_v2 = vpop.permute.xlu2 %1105 }
 0x1f4   :  { %v1098_v3 = vpop.permute.xlu1 %1097  ;;  %v1505_v4 = vpop.permute.xlu0 %1504  ;;  %v2562_v5 = vsel %vm220_vm2, %v1106_v2, %v1082_v46 }
 0x1f5   :  { %3526 = vst [vmem:[#allocation11_spill] sm:$0xff] %v2562_v5  ;;  %v2566_v8 = vsel %vm220_vm2, %v1090_v40, %v1098_v3  ;;  %v2570_v9 = vsel %vm321_vm7, %v1497_v62, %v1505_v4  ;;  %v2574_v10 = vsel %vm220_vm2, %v1098_v3, %v1106_v2  ;;  %v2669_v40 = vpop.f32.mrf.mxu0 }
 0x1f6   :  { %3527 = vst [vmem:[#allocation12_spill] sm:$0xff] %v2566_v8 }
 0x1f7   :  { %3528 = vst [vmem:[#allocation13_spill] sm:$0xff] %v2570_v9 }
 0x1f8   :  { %3529 = vst [vmem:[#allocation14_spill] sm:$0xff] %v2574_v10 }
 0x1f9   :  { %612 = vrot.lane.b32.xlu2 %v2497_v52, %s2099_s22  ;;  %3540 = vst [vmem:[#allocation25_spill] sm:$0xff] %v2669_v40 }
 0x1fa   :  { %620 = vrot.lane.b32.xlu0 %v2576_v11, %s2099_s22  ;;  %1508 = vrot.lane.b32.xlu1 %v2497_v52, %s2104_s26 }
 0x1fb   :  { %v1358_v12 = vpop.permute.xlu2 %1357 }
 0x1fc   :  { %v1350_v14 = vpop.permute.xlu1 %1349  ;;  %v700_v15 = vpop.permute.xlu0 %699  ;;  %v2586_v16 = vsel %vm278_vm5, %v1358_v12, %v1334_v47 }
 0x1fd   :  { %3530 = vst [vmem:[#allocation15_spill] sm:$0xff] %v2586_v16  ;;  %v2590_v17 = vsel %vm278_vm5, %v1342_v53, %v1350_v14  ;;  %v2594_v19 = vsel %vm134_vm3, %v692_v7, %v700_v15  ;;  %v2598_v20 = vsel %vm134_vm3, %v700_v15, %v676_v13  ;;  %v2602_v21 = vsel %vm278_vm5, %v1350_v14, %v1358_v12 }
 0x1fe   :  { %3531 = vst [vmem:[#allocation16_spill] sm:$0xff] %v2590_v17 }
 0x1ff   :  { %3532 = vst [vmem:[#allocation17_spill] sm:$0xff] %v2602_v21 }
 0x201   :  { %679 = vrot.lane.b32.xlu2 %v2495_v51, %s2100_s0 }
 0x202   :  { %946 = vrot.lane.b32.xlu0 %v2604_v22, %s2101_s23  ;;  %628 = vrot.lane.b32.xlu1 %v2604_v22, %s2099_s22 }
 0x203   :  { %v1513_v23 = vpop.permute.xlu2 %1512 }
 0x204   :  { %v611_v24 = vpop.permute.xlu1 %610  ;;  %v935_v25 = vpop.permute.xlu0 %934  ;;  %v2614_v26 = vsel %vm321_vm7, %v1505_v4, %v1513_v23 }
 0x205   :  { %3534 = vst [vmem:[#allocation19_spill] sm:$0xff] %v2614_v26  ;;  %v2618_v27 = vsel %vm177_vm4, %v935_v25, %v943_v61  ;;  %v2623_v28 = vsel %vm177_vm4, %v2477_v45, %v935_v25 }
 0x206   :  { %3535 = vst [vmem:[#allocation20_spill] sm:$0xff] %v2618_v27 }
 0x207   :  { %3536 = vst [vmem:[#allocation21_spill] sm:$0xff] %v2623_v28 }
 0x209   :  { %1337 = vrot.lane.b32.xlu2 %v2495_v51, %s2103_s25 }
 0x20a   :  { %1109 = vrot.lane.b32.xlu0 %v2604_v22, %s2102_s24  ;;  %695 = vrot.lane.b32.xlu1 %v2576_v11, %s2100_s0 }
 0x20b   :  { %v686_v29 = vpop.permute.xlu2 %685 }
 0x20c   :  { %v1521_v30 = vpop.permute.xlu0 %1520  ;;  %v678_v31 = vpop.permute.xlu1 %677 }
 0x20d   :  { %v2633_v32 = vsel %vm321_vm7, %v1513_v23, %v1521_v30  ;;  %v2637_v37 = vsel %vm321_vm7, %v1521_v30, %v1497_v62  ;;  %v2641_v42 = vsel %vm134_vm3, %v678_v31, %v686_v29 }
 0x20e   :  { %3537 = vst [vmem:[#allocation22_spill] sm:$0xff] %v2633_v32 }
 0x20f   :  { %3538 = vst [vmem:[#allocation23_spill] sm:$0xff] %v2637_v37 }
 0x211   :  { %1500 = vrot.lane.b32.xlu2 %v2495_v51, %s2104_s26 }
 0x212   :  { %1353 = vrot.lane.b32.xlu0 %v2576_v11, %s2103_s25  ;;  %1361 = vrot.lane.b32.xlu1 %v2604_v22, %s2103_s25 }
 0x213   :  { %v921_v45 = vpop.permute.xlu2 %920 }
 0x214   :  { %v1092_v46 = vpop.permute.xlu1 %1091  ;;  %v603_v47 = vpop.permute.xlu0 %602 }
 0x215   :  { %v2651_v48 = vsel %vm92_vm1, %v603_v47, %v611_v24 }
 0x219   :  { %703 = vrot.lane.b32.xlu2 %v2604_v22, %s2100_s0 }
 0x21a   :  { %614 = vrot.lane.b32.xlu0 %v2653_v49, %s2099_s22  ;;  %1524 = vrot.lane.b32.xlu1 %v2604_v22, %s2104_s26 }
 0x21b   :  { %v1336_v53 = vpop.permute.xlu2 %1335 }
 0x21c   :  { %v1344_v54 = vpop.permute.xlu1 %1343  ;;  %v929_v13 = vpop.permute.xlu0 %928 }
 0x21d   :  { %v2663_v57 = vsel %vm278_vm5, %v1336_v53, %v1344_v54  ;;  %v2667_v18 = vsel %vm177_vm4, %v921_v45, %v929_v13 }
 0x21e   :  { %3539 = vst [vmem:[#allocation24_spill] sm:$0xff] %v2663_v57 }
 0x221   :  { %938 = vrot.lane.b32.xlu2 %v2576_v11, %s2101_s23 }
 0x222   :  { %1516 = vrot.lane.b32.xlu1 %v2576_v11, %s2104_s26  ;;  %681 = vrot.lane.b32.xlu0 %v2669_v40, %s2100_s0 }
 0x223   :  { %v1507_v7 = vpop.permute.xlu2 %1506 }
 0x224   :  { %v2677_v61 = vpop.permute.xlu1 %1661  ;;  %v1084_v62 = vpop.permute.xlu0 %1083 }
 0x225   :  { %3541 = vst [vmem:[#allocation26_spill] sm:$0xff] %v2677_v61  ;;  %v2681_v2 = vsel %vm220_vm2, %v1084_v62, %v1092_v46 }
 0x229   :  { %1101 = vrot.lane.b32.xlu2 %v2576_v11, %s2102_s24 }
 0x22a   :  { %689 = vrot.lane.b32.xlu1 %v2653_v49, %s2100_s0  ;;  %1339 = vrot.lane.b32.xlu0 %v2669_v40, %s2103_s25 }
 0x22b   :  { %v619_v3 = vpop.permute.xlu2 %618 }
 0x22c   :  { %v2691_v4 = vsel %vm92_vm1, %v611_v24, %v619_v3  ;;  %v702_v12 = vpop.permute.xlu1 %701  ;;  %v1499_v14 = vpop.permute.xlu0 %1498 }
 0x22d   :  { %v2695_v15 = vsel %vm134_vm3, %v702_v12, %v678_v31  ;;  %v2699_v23 = vsel %vm321_vm7, %v1499_v14, %v1507_v7 }
 0x22e   :  { %3542 = vst [vmem:[#allocation27_spill] sm:$0xff] %v2699_v23 }
 0x231   :  { %1687 = vrot.lane.b32.xlu2 %v2604_v22, %s2105_s27 }
 0x232   :  { %924 = vrot.lane.b32.xlu1 %v2669_v40, %s2101_s23  ;;  %1347 = vrot.lane.b32.xlu0 %v2653_v49, %s2103_s25 }
 0x233   :  { %v945_v24 = vpop.permute.xlu2 %944 }
 0x234   :  { %v2709_v25 = vsel %vm177_vm4, %v945_v24, %v921_v45  ;;  %v937_v30 = vpop.permute.xlu1 %936  ;;  %v627_v31 = vpop.permute.xlu0 %626 }
 0x235   :  { %3543 = vst [vmem:[#allocation28_spill] sm:$0xff] %v2709_v25  ;;  %v2713_v61 = vsel %vm177_vm4, %v937_v30, %v945_v24  ;;  %v2717_v23 = vsel %vm177_vm4, %v929_v13, %v937_v30  ;;  %v2721_v37 = vsel %vm92_vm1, %v619_v3, %v627_v31  ;;  %v2725_v9 = vsel %vm92_vm1, %v627_v31, %v603_v47 }
 0x236   :  { %3544 = vst [vmem:[#allocation29_spill] sm:$0xff] %v2713_v61 }
 0x239   :  { %606 = vrot.lane.b32.xlu2 %v2669_v40, %s2099_s22 }
 0x23a   :  { %1095 = vrot.lane.b32.xlu1 %v2653_v49, %s2102_s24  ;;  %1665 = vrot.lane.b32.xlu0 %v2669_v40, %s2105_s27 }
 0x23b   :  { %v1100_v45 = vpop.permute.xlu2 %1099 }
 0x23c   :  { %v2735_v13 = vsel %vm220_vm2, %v1092_v46, %v1100_v45  ;;  %v1360_v3 = vpop.permute.xlu1 %1359  ;;  %v694_v24 = vpop.permute.xlu0 %693 }
 0x23d   :  { %3545 = vst [vmem:[#allocation30_spill] sm:$0xff] %v2735_v13  ;;  %v2739_v47 = vsel %vm278_vm5, %v1360_v3, %v1336_v53  ;;  %v2743_v30 = vsel %vm134_vm3, %v694_v24, %v702_v12  ;;  %v2747_v31 = vsel %vm134_vm3, %v686_v29, %v694_v24 }
 0x23e   :  { %3546 = vst [vmem:[#allocation31_spill] sm:$0xff] %v2739_v47 }
 0x241   :  { %932 = vrot.lane.b32.xlu2 %v2653_v49, %s2101_s23 }
 0x242   :  { %1510 = vrot.lane.b32.xlu1 %v2653_v49, %s2104_s26  ;;  %1685 = vrot.lane.b32.xlu0 %v2461_v41, %s2105_s27 }
 0x243   :  { %v1523_v46 = vpop.permute.xlu2 %1522 }
 0x244   :  { %v2757_v53 = vsel %vm321_vm7, %v1523_v46, %v1499_v14  ;;  %v1352_v12 = vpop.permute.xlu1 %1351  ;;  %v1108_v32 = vpop.permute.xlu0 %1107 }
 0x245   :  { %3547 = vst [vmem:[#allocation32_spill] sm:$0xff] %v2757_v53  ;;  %v2761_v29 = vsel %vm278_vm5, %v1352_v12, %v1360_v3  ;;  %v2765_v24 = vsel %vm278_vm5, %v1344_v54, %v1352_v12  ;;  %v2769_v26 = vsel %vm220_vm2, %v1100_v45, %v1108_v32  ;;  %v2773_v16 = vsel %vm220_vm2, %v1108_v32, %v1084_v62  ;;  %v2775_v14 = vpop.f32.mrf.mxu2  ;;  %v2791_v12 = vpop.f32.mrf.mxu3 }
 0x246   :  { %3548 = vst [vmem:[#allocation33_spill] sm:$0xff] %v2761_v29 }
 0x247   :  { %3549 = vst [vmem:[#allocation34_spill] sm:$0xff] %v2765_v24 }
 0x248   :  { %3550 = vst [vmem:[#allocation35_spill] sm:$0xff] %v2769_v26 }
 0x249   :  { %3551 = vst [vmem:[#allocation36_spill] sm:$0xff] %v2773_v16  ;;  %1087 = vrot.lane.b32.xlu2 %v2669_v40, %s2102_s24 }
 0x24a   :  { %622 = vrot.lane.b32.xlu1 %v2775_v14, %s2099_s22  ;;  %1677 = vrot.lane.b32.xlu0 %v2469_v43, %s2105_s27  ;;  %3554 = vst [vmem:[#allocation39_spill] sm:$0xff] %v2791_v12 }
 0x24b   :  { %v1515_v54 = vpop.permute.xlu2 %1514 }
 0x24c   :  { %v2785_v45 = vsel %vm321_vm7, %v1515_v54, %v1523_v46  ;;  %v2789_v32 = vsel %vm321_vm7, %v1507_v7, %v1515_v54  ;;  %v688_v62 = vpop.permute.xlu0 %687  ;;  %v605_v3 = vpop.permute.xlu1 %604 }
 0x24d   :  { %3552 = vst [vmem:[#allocation37_spill] sm:$0xff] %v2785_v45 }
 0x24e   :  { %3553 = vst [vmem:[#allocation38_spill] sm:$0xff] %v2789_v32 }
 0x251   :  { %1502 = vrot.lane.b32.xlu2 %v2669_v40, %s2104_s26 }
 0x252   :  { %1659 = vrot.lane.b32.xlu1 %v2376_v33, %s2105_s27  ;;  %705 = vrot.lane.b32.xlu0 %v2791_v12, %s2100_s0 }
 0x253   :  { %v613_v53 = vpop.permute.xlu2 %612 }
 0x254   :  { %v2801_v46 = vsel %vm92_vm1, %v605_v3, %v613_v53  ;;  %v923_v7 = vpop.permute.xlu0 %922  ;;  %v931_v54 = vpop.permute.xlu1 %930 }
 0x255   :  { %v2805_v45 = vsel %vm177_vm4, %v923_v7, %v931_v54 }
 0x259   :  { %630 = vrot.lane.b32.xlu2 %v2791_v12, %s2099_s22 }
 0x25a   :  { %1683 = vrot.lane.b32.xlu1 %v2400_v36, %s2105_s27  ;;  %940 = vrot.lane.b32.xlu0 %v2775_v14, %s2101_s23 }
 0x25b   :  { %v680_v32 = vpop.permute.xlu2 %679 }
 0x25c   :  { %v1346_v1 = vpop.permute.xlu0 %1345  ;;  %v2815_v47 = vsel %vm134_vm3, %v680_v32, %v688_v62  ;;  %v1086_v57 = vpop.permute.xlu1 %1085 }
 0x261   :  { %697 = vrot.lane.b32.xlu2 %v2775_v14, %s2100_s0 }
 0x262   :  { %948 = vrot.lane.b32.xlu1 %v2791_v12, %s2101_s23  ;;  %1111 = vrot.lane.b32.xlu0 %v2791_v12, %s2102_s24 }
 0x263   :  { %v1338_v21 = vpop.permute.xlu2 %1337 }
 0x264   :  { %v2823_v29 = vpop.permute.xlu0 %1663  ;;  %v2827_v17 = vsel %vm278_vm5, %v1338_v21, %v1346_v1  ;;  %v1094_v10 = vpop.permute.xlu1 %1093 }
 0x265   :  { %3555 = vst [vmem:[#allocation40_spill] sm:$0xff] %v2823_v29  ;;  %v2831_v24 = vsel %vm220_vm2, %v1086_v57, %v1094_v10 }
 0x266   :  { %3556 = vst [vmem:[#allocation41_spill] sm:$0xff] %v2827_v17 }
 0x269   :  { %1679 = vrot.lane.b32.xlu2 %v2576_v11, %s2105_s27 }
 0x26a   :  { %1363 = vrot.lane.b32.xlu1 %v2791_v12, %s2103_s25  ;;  %1355 = vrot.lane.b32.xlu0 %v2775_v14, %s2103_s25 }
 0x26b   :  { %v1501_v5 = vpop.permute.xlu2 %1500 }
 0x26c   :  { %v621_v29 = vpop.permute.xlu0 %620  ;;  %v1509_v26 = vpop.permute.xlu1 %1508 }
 0x26d   :  { %v2841_v17 = vsel %vm92_vm1, %v613_v53, %v621_v29  ;;  %v2845_v16 = vsel %vm321_vm7, %v1501_v5, %v1509_v26 }
 0x26e   :  { %3557 = vst [vmem:[#allocation42_spill] sm:$0xff] %v2845_v16 }
 0x271   :  { %1673 = vrot.lane.b32.xlu2 %v2653_v49, %s2105_s27 }
 0x272   :  { %1689 = vrot.lane.b32.xlu1 %v2791_v12, %s2105_s27  ;;  %1526 = vrot.lane.b32.xlu0 %v2791_v12, %s2104_s26 }
 0x273   :  { %v704_v27 = vpop.permute.xlu2 %703 }
 0x274   :  { %v947_v8 = vpop.permute.xlu0 %946  ;;  %v2855_v0 = vsel %vm134_vm3, %v704_v27, %v680_v32  ;;  %v629_v53 = vpop.permute.xlu1 %628 }
 0x275   :  { %v2859_v13 = vsel %vm177_vm4, %v947_v8, %v923_v7  ;;  %v2863_v16 = vsel %vm92_vm1, %v621_v29, %v629_v53  ;;  %v2867_v61 = vsel %vm92_vm1, %v629_v53, %v605_v3 }
 0x276   :  { %3558 = vst [vmem:[#allocation43_spill] sm:$0xff] %v2859_v13 }
 0x279   :  { %1103 = vrot.lane.b32.xlu2 %v2775_v14, %s2102_s24 }
 0x27a   :  { %1681 = vrot.lane.b32.xlu1 %v2775_v14, %s2105_s27  ;;  %1518 = vrot.lane.b32.xlu0 %v2775_v14, %s2104_s26 }
 0x27b   :  { %v939_v32 = vpop.permute.xlu2 %938 }
 0x27c   :  { %v1110_v7 = vpop.permute.xlu0 %1109  ;;  %v2877_v25 = vsel %vm177_vm4, %v939_v32, %v947_v8  ;;  %v2881_v29 = vsel %vm177_vm4, %v931_v54, %v939_v32  ;;  %v696_v3 = vpop.permute.xlu1 %695 }
 0x27d   :  { %v2885_v53 = vsel %vm220_vm2, %v1110_v7, %v1086_v57  ;;  %v2889_v13 = vsel %vm134_vm3, %v696_v3, %v704_v27  ;;  %v2893_v28 = vsel %vm134_vm3, %v688_v62, %v696_v3 }
 0x281   :  { %1671 = vrot.lane.b32.xlu2 %v2497_v52, %s2105_s27 }
 0x282   :  { %1828 = vrot.lane.b32.xlu1 %v2669_v40, %s2106_s28  ;;  %1675 = vrot.lane.b32.xlu0 %v2392_v35, %s2105_s27 }
 0x283   :  { %v1102_v8 = vpop.permute.xlu2 %1101 }
 0x284   :  { %v1354_v57 = vpop.permute.xlu0 %1353  ;;  %v2903_v54 = vsel %vm220_vm2, %v1102_v8, %v1110_v7  ;;  %v2907_v27 = vsel %vm220_vm2, %v1094_v10, %v1102_v8  ;;  %v1362_v62 = vpop.permute.xlu1 %1361 }
 0x285   :  { %v2911_v32 = vsel %vm278_vm5, %v1346_v1, %v1354_v57  ;;  %v2915_v3 = vsel %vm278_vm5, %v1354_v57, %v1362_v62  ;;  %v2919_v40 = vsel %vm278_vm5, %v1362_v62, %v1338_v21 }
 0x286   :  { %3559 = vst [vmem:[#allocation44_spill] sm:$0xff] %v2915_v3 }
 0x287   :  { %3560 = vst [vmem:[#allocation45_spill] sm:$0xff] %v2919_v40 }
 0x289   :  { %1852 = vrot.lane.b32.xlu2 %v2791_v12, %s2106_s28 }
 0x28a   :  { %1826 = vrot.lane.b32.xlu1 %v2495_v51, %s2106_s28  ;;  %1669 = vrot.lane.b32.xlu0 %v2427_v38, %s2105_s27 }
 0x28b   :  { %v2927_v10 = vpop.permute.xlu2 %1687 }
 0x28c   :  { %3561 = vst [vmem:[#allocation46_spill] sm:$0xff] %v2927_v10  ;;  %v2929_v1 = vpop.permute.xlu0 %614  ;;  %v1525_v7 = vpop.permute.xlu1 %1524 }
 0x28d   :  { %v2933_v8 = vsel %vm321_vm7, %v1525_v7, %v1501_v5 }
 0x28e   :  { %3562 = vst [vmem:[#allocation47_spill] sm:$0xff] %v2933_v8  ;;  %v2958_v8 = vld [vmem:[%s3499_s4 + $0x1] ss:$8 sm:$0xf] }
 0x291   :  { %1844 = vrot.lane.b32.xlu2 %v2775_v14, %s2106_s28 }
 0x292   :  { %1667 = vrot.lane.b32.xlu1 %v2378_v34, %s2105_s27  ;;  %1850 = vrot.lane.b32.xlu0 %v2604_v22, %s2106_s28 }
 0x293   :  { %v2941_v21 = vpop.permute.xlu2 %606 }
 0x294   :  { %v1517_v57 = vpop.permute.xlu1 %1516  ;;  %v2943_v62 = vpop.permute.xlu0 %681 }
 0x295   :  { %v2947_v10 = vsel %vm321_vm7, %v1517_v57, %v1525_v7  ;;  %v2951_v5 = vsel %vm321_vm7, %v1509_v26, %v1517_v57  ;;  %v726_v57 = vperm.slane %v2958_v8, 1 }
 0x296   :  { %3563 = vst [vmem:[#allocation48_spill] sm:$0xff] %v2947_v10 }
 0x297   :  { %3564 = vst [vmem:[#allocation49_spill] sm:$0xff] %v2951_v5  ;;  %v734_v12 = vmul.f32 %v726_v57, %v2516_v56 }
 0x299   :  { %1824 = vrot.lane.b32.xlu2 %v2435_v39, %s2106_s28  ;;  %v742_v39 = vmul.f32 %v726_v57, %v2815_v47 }
 0x29a   :  { %1848 = vrot.lane.b32.xlu1 %v2461_v41, %s2106_s28  ;;  %1842 = vrot.lane.b32.xlu0 %v2576_v11, %s2106_s28  ;;  %v2978_v41 = vld [vmem:[%s3499_s4] ss:$8 sm:$0xf] }
 0x29b   :  { %v2964_v7 = vpop.permute.xlu2 %932  ;;  %v651_v47 = vperm.slane %v2978_v41, 1 }
 0x29c   :  { %v2966_v10 = vpop.permute.xlu1 %689  ;;  %v2968_v26 = vpop.permute.xlu0 %1339 }
 0x29d   :  { %3565 = vst [vmem:[#allocation50_spill] sm:$0xff] %v2968_v26  ;;  %v718_v5 = vsel %vm134_vm3, %v2943_v62, %v2966_v10  ;;  %v663_v56 = vmul.f32 %v651_v47, %v2651_v48 }
 0x29e   :  { %v746_v40 = vmul.f32 %v726_v57, %v718_v5  ;;  %v738_v5 = vmul.f32 %v726_v57, %v2641_v42  ;;  %v3009_v42 = vld [vmem:[%s3501_s2 + $0x4] sm:$0x7] }
 0x2a0   :  { %787 = vmatpush.msrb.mxu1 %v746_v40  ;;  %v643_v40 = vsel %vm92_vm1, %v2941_v21, %v2929_v1 }
 0x2a1   :  { %1822 = vrot.lane.b32.xlu2 %v2376_v33, %s2106_s28 }
 0x2a2   :  { %1840 = vrot.lane.b32.xlu1 %v2469_v43, %s2106_s28  ;;  %1836 = vrot.lane.b32.xlu0 %v2653_v49, %s2106_s28  ;;  %v667_v43 = vmul.f32 %v651_v47, %v2801_v46 }
 0x2a3   :  { %788 = vmatpush.msrb.mxu1 %v742_v39  ;;  %v2992_v22 = vpop.permute.xlu2 %1087  ;;  %v671_v39 = vmul.f32 %v651_v47, %v643_v40  ;;  %v659_v40 = vmul.f32 %v651_v47, %v2493_v50 }
 0x2a4   :  { %v2995_v51 = vpop.permute.xlu1 %924  ;;  %v2997_v33 = vpop.permute.xlu0 %1347 }
 0x2a5   :  { %789 = vmatpush.msrb.mxu1 %v738_v5  ;;  %v3003_v3 = vsel %vm278_vm5, %v2968_v26, %v2997_v33  ;;  %v3014_v5 = vld [vmem:[%s3499_s4 + $0x2] ss:$8 sm:$0xf] }
 0x2a6   :  { %3566 = vst [vmem:[#allocation51_spill] sm:$0xff] %v3003_v3  ;;  %v969_v46 = vperm.slane %v3014_v5, 1  ;;  %v3047_v26 = vld [vmem:[%s3501_s2] sm:$0x7] }
 0x2a7   :  { %790 = vmatpush.msrb.mxu1 %v734_v12  ;;  %v961_v12 = vsel %vm177_vm4, %v2995_v51, %v2964_v7 }
 0x2a8   :  { %2038 = vmatmul.msk.f32.vlgmr.msrb.gmra.mxu1 %vm751_vm10, %v3009_v42  ;;  %v985_v3 = vmul.f32 %v969_v46, %v2805_v45  ;;  %v981_v50 = vmul.f32 %v969_v46, %v2667_v18 }
 0x2a9   :  { %870 = vmatpush.msra.mxu1 %v671_v39  ;;  %1846 = vrot.lane.b32.xlu2 %v2400_v36, %s2106_s28  ;;  %v989_v36 = vmul.f32 %v969_v46, %v961_v12 }
 0x2aa   :  { %1838 = vrot.lane.b32.xlu1 %v2392_v35, %s2106_s28  ;;  %1834 = vrot.lane.b32.xlu0 %v2497_v52, %s2106_s28 }
 0x2ab   :  { %871 = vmatpush.msra.mxu1 %v667_v43  ;;  %v3031_v57 = vpop.permute.xlu2 %1502  ;;  %v3041_v43 = vld [vmem:[%s3499_s4 + $0x3] ss:$8 sm:$0xf] }
 0x2ac   :  { %v3034_v48 = vpop.permute.xlu1 %1095  ;;  %v3036_v39 = vpop.permute.xlu0 %1665 }
 0x2ad   :  { %872 = vmatpush.msra.mxu1 %v663_v56  ;;  %3567 = vst [vmem:[#allocation52_spill] sm:$0xff] %v3036_v39  ;;  %v1124_v47 = vsel %vm220_vm2, %v2992_v22, %v3034_v48  ;;  %v1132_v56 = vperm.slane %v3041_v43, 1 }
 0x2af   :  { %873 = vmatpush.msra.mxu1 %v659_v40  ;;  %v1152_v45 = vmul.f32 %v1132_v56, %v1124_v47  ;;  %v1140_v47 = vmul.f32 %v1132_v56, %v2534_v60 }
 0x2b0   :  { %2042 = vmatmul.msk.f32.vlgmr.msra.gmra.mxu1 %vm751_vm10, %v3047_v26 }
 0x2b1   :  { %1029 = vmatpush.msrb.mxu1 %v989_v36  ;;  %1832 = vrot.lane.b32.xlu2 %v2427_v38, %s2106_s28  ;;  %v977_v36 = vmul.f32 %v969_v46, %v2512_v55  ;;  %v1148_v55 = vmul.f32 %v1132_v56, %v2831_v24  ;;  %v1144_v46 = vmul.f32 %v1132_v56, %v2681_v2 }
 0x2b2   :  { %1830 = vrot.lane.b32.xlu0 %v2378_v34, %s2106_s28 }
 0x2b3   :  { %1030 = vmatpush.msrb.mxu1 %v985_v3  ;;  %v3062_v18 = vpop.permute.xlu2 %630 }
 0x2b4   :  { %v3064_v12 = vpop.permute.xlu1 %1510  ;;  %v3066_v3 = vpop.permute.xlu0 %1685 }
 0x2b5   :  { %1031 = vmatpush.msrb.mxu1 %v981_v50  ;;  %v3072_v40 = vsel %vm321_vm7, %v3031_v57, %v3064_v12  ;;  %v3079_v50 = vld [vmem:[%s3501_s2 + $0x8] sm:$0x7] }
 0x2b7   :  { %1032 = vmatpush.msrb.mxu1 %v977_v36  ;;  %v727_v36 = vperm.slane %v2958_v8, 2 }
 0x2b8   :  { %2048 = vmatmul.msk.f32.vlgmr.msrb.gmra.mxu1 %vm751_vm10, %v3079_v50 }
 0x2b9   :  { %1192 = vmatpush.msra.mxu1 %v1152_v45 }
 0x2bb   :  { %1193 = vmatpush.msra.mxu1 %v1148_v55  ;;  %v698_v39 = vpop.permute.xlu2 %697  ;;  %v743_v55 = vmul.f32 %v727_v36, %v2893_v28 }
 0x2bc   :  { %v623_v24 = vpop.permute.xlu1 %622  ;;  %v3085_v45 = vpop.permute.xlu0 %1677  ;;  %v714_v2 = vsel %vm134_vm3, %v2966_v10, %v698_v39  ;;  %v3104_v10 = vld [vmem:[%s3501_s2 + $0xc] sm:$0x7] }
 0x2bd   :  { %1194 = vmatpush.msra.mxu1 %v1144_v46  ;;  %v3094_v60 = vsel %vm364_vm6, %v3085_v45, %v3066_v3  ;;  %v747_v56 = vmul.f32 %v727_v36, %v714_v2  ;;  %v739_v46 = vmul.f32 %v727_v36, %v2747_v31  ;;  %v725_v2 = vperm.slane %v2958_v8, 0 }
 0x2bf   :  { %1195 = vmatpush.msra.mxu1 %v1140_v47  ;;  %807 = vmatpush.msrb.mxu2 %v747_v56  ;;  %v652_v47 = vperm.slane %v2978_v41, 2  ;;  %v728_v56 = vperm.slane %v2958_v8, 3  ;;  %v741_v8 = vmul.f32 %v725_v2, %v2855_v0  ;;  %v647_v0 = vsel %vm92_vm1, %v3062_v18, %v2941_v21 }
 0x2c0   :  { %2054 = vmatmul.msk.f32.vlgmr.msra.gmra.mxu1 %vm751_vm10, %v3104_v10  ;;  %v733_v21 = vmul.f32 %v725_v2, %v2598_v20 }
 0x2c1   :  { %1281 = vmatpush.msrb.mxu1 %v2653_v49  ;;  %808 = vmatpush.msrb.mxu2 %v743_v55  ;;  %v639_v49 = vsel %vm92_vm1, %v2929_v1, %v623_v24 }
 0x2c2   :  { %v672_v1 = vmul.f32 %v652_v47, %v639_v49  ;;  %v744_v49 = vmul.f32 %v728_v56, %v2889_v13 }
 0x2c3   :  { %1282 = vmatpush.msrb.mxu1 %v2497_v52  ;;  %809 = vmatpush.msrb.mxu2 %v739_v46  ;;  %v3111_v52 = vpop.permute.xlu2 %1679  ;;  %v668_v46 = vmul.f32 %v652_v47, %v2841_v17  ;;  %v650_v17 = vperm.slane %v2978_v41, 0 }
 0x2c4   :  { %v3114_v28 = vpop.permute.xlu1 %1659  ;;  %v706_v31 = vpop.permute.xlu0 %705 }
 0x2c5   :  { %1283 = vmatpush.msrb.mxu1 %v2427_v38  ;;  %v735_v38 = vmul.f32 %v727_v36, %v2548_v63  ;;  %v710_v55 = vsel %vm134_vm3, %v698_v39, %v706_v31  ;;  %v664_v39 = vmul.f32 %v652_v47, %v2691_v4  ;;  %v3144_v4 = vld [vmem:[%s3501_s2 + $0x10] sm:$0x7] }
 0x2c6   :  { %v748_v36 = vmul.f32 %v728_v56, %v710_v55  ;;  %v653_v55 = vperm.slane %v2978_v41, 3  ;;  %v666_v41 = vmul.f32 %v650_v17, %v2867_v61 }
 0x2c7   :  { %1284 = vmatpush.msrb.mxu1 %v2378_v34  ;;  %v722_v34 = vsel %vm134_vm3, %v706_v31, %v2943_v62  ;;  %810 = vmatpush.msrb.mxu2 %v735_v38  ;;  %v737_v62 = vmul.f32 %v725_v2, %v2695_v15  ;;  %v740_v38 = vmul.f32 %v728_v56, %v2743_v30  ;;  %v970_v15 = vperm.slane %v3014_v5, 2 }
 0x2c8   :  { %2039 = vmatmul.msk.f32.vlgmr.msrb.gmra.mxu2 %vm751_vm10, %v3009_v42  ;;  %v745_v63 = vmul.f32 %v725_v2, %v722_v34  ;;  %827 = vmatpush.msrb.mxu3 %v748_v36  ;;  %v660_v31 = vmul.f32 %v652_v47, %v2530_v59  ;;  %v635_v59 = vsel %vm92_vm1, %v623_v24, %v3062_v18  ;;  %v968_v2 = vperm.slane %v3014_v5, 0 }
 0x2c9   :  { %890 = vmatpush.msra.mxu2 %v672_v1  ;;  %v736_v1 = vmul.f32 %v728_v56, %v2594_v19  ;;  %2059 = vmatmul.msk.f32.vlgmr.msrb.gmra.mxu1 %vm751_vm10, %v3144_v4  ;;  %v670_v18 = vmul.f32 %v650_v17, %v647_v0  ;;  %v669_v19 = vmul.f32 %v653_v55, %v2863_v16 }
 0x2ca   :  { %767 = vmatpush.msrb.mxu0 %v745_v63  ;;  %828 = vmatpush.msrb.mxu3 %v744_v49  ;;  %v673_v63 = vmul.f32 %v653_v55, %v635_v59  ;;  %v986_v20 = vmul.f32 %v970_v15, %v2881_v29  ;;  %v982_v56 = vmul.f32 %v970_v15, %v2717_v23  ;;  %v971_v29 = vperm.slane %v3014_v5, 3  ;;  %v3568_v49 = vld [vmem:[#allocation21_spill] sm:$0xff] }
 0x2cb   :  { %891 = vmatpush.msra.mxu2 %v668_v46  ;;  %v3139_v13 = vpop.permute.xlu2 %1673  ;;  %v658_v36 = vmul.f32 %v650_v17, %v2526_v58  ;;  %v661_v16 = vmul.f32 %v653_v55, %v2538_v6  ;;  %v1133_v23 = vperm.slane %v3041_v43, 2  ;;  %v3571_v59 = vld [vmem:[#allocation29_spill] sm:$0xff] }
 0x2cc   :  { %768 = vmatpush.msrb.mxu0 %v741_v8  ;;  %v3150_v30 = vpop.permute.xlu1 %1683  ;;  %v941_v47 = vpop.permute.xlu0 %940  ;;  %829 = vmatpush.msrb.mxu3 %v740_v38 }
 0x2cd   :  { %892 = vmatpush.msra.mxu2 %v664_v39  ;;  %v957_v34 = vsel %vm177_vm4, %v2964_v7, %v941_v47  ;;  %v662_v7 = vmul.f32 %v650_v17, %v2725_v9  ;;  %v3570_v17 = vld [vmem:[#allocation28_spill] sm:$0xff] }
 0x2ce   :  { %769 = vmatpush.msrb.mxu0 %v737_v62  ;;  %v990_v24 = vmul.f32 %v970_v15, %v957_v34  ;;  %830 = vmatpush.msrb.mxu3 %v736_v1  ;;  %v980_v0 = vmul.f32 %v968_v2, %v3570_v17  ;;  %v3585_v17 = vld [vmem:[#allocation44_spill] sm:$0xff] }
 0x2cf   :  { %893 = vmatpush.msra.mxu2 %v660_v31  ;;  %2040 = vmatmul.msk.f32.vlgmr.msrb.gmra.mxu3 %vm751_vm10, %v3009_v42  ;;  %v1149_v31 = vmul.f32 %v1133_v23, %v2907_v27  ;;  %v3573_v27 = vld [vmem:[#allocation10_spill] sm:$0xff] }
 0x2d0   :  { %770 = vmatpush.msrb.mxu0 %v733_v21  ;;  %2043 = vmatmul.msk.f32.vlgmr.msra.gmra.mxu2 %vm751_vm10, %v3047_v26  ;;  %v976_v34 = vmul.f32 %v968_v2, %v3573_v27  ;;  %v3587_v27 = vld [vmem:[#allocation33_spill] sm:$0xff] }
 0x2d1   :  { %2037 = vmatmul.msk.f32.vlgmr.msrb.gmra.mxu0 %vm751_vm10, %v3009_v42  ;;  %910 = vmatpush.msra.mxu3 %v673_v63  ;;  %v665_v42 = vmul.f32 %v653_v55, %v2721_v37  ;;  %v978_v37 = vmul.f32 %v970_v15, %v3568_v49 }
 0x2d2   :  { %850 = vmatpush.msra.mxu0 %v670_v18  ;;  %1049 = vmatpush.msrb.mxu2 %v990_v24  ;;  %v1131_v18 = vperm.slane %v3041_v43, 0 }
 0x2d3   :  { %911 = vmatpush.msra.mxu3 %v669_v19  ;;  %v1104_v61 = vpop.permute.xlu2 %1103 }
 0x2d4   :  { %851 = vmatpush.msra.mxu0 %v666_v41  ;;  %1050 = vmatpush.msrb.mxu2 %v986_v20  ;;  %v949_v46 = vpop.permute.xlu1 %948  ;;  %v1112_v8 = vpop.permute.xlu0 %1111  ;;  %v1120_v9 = vsel %vm220_vm2, %v3034_v48, %v1104_v61  ;;  %v3569_v48 = vld [vmem:[#allocation43_spill] sm:$0xff]  ;;  %v3574_v41 = vld [vmem:[#allocation12_spill] sm:$0xff] }
 0x2d5   :  { %912 = vmatpush.msra.mxu3 %v665_v42  ;;  %v953_v39 = vsel %vm177_vm4, %v941_v47, %v949_v46  ;;  %v965_v58 = vsel %vm177_vm4, %v949_v46, %v2995_v51  ;;  %v1153_v62 = vmul.f32 %v1133_v23, %v1120_v9  ;;  %v984_v38 = vmul.f32 %v968_v2, %v3569_v48  ;;  %v3577_v9 = vld [vmem:[#allocation35_spill] sm:$0xff] }
 0x2d6   :  { %852 = vmatpush.msra.mxu0 %v662_v7  ;;  %1051 = vmatpush.msrb.mxu2 %v982_v56  ;;  %v988_v6 = vmul.f32 %v968_v2, %v965_v58  ;;  %v991_v5 = vmul.f32 %v971_v29, %v953_v39  ;;  %v987_v51 = vmul.f32 %v971_v29, %v2877_v25  ;;  %v3205_v25 = vld [vmem:[%s3499_s4 + $0x5] ss:$8 sm:$0xf]  ;;  %v1134_v42 = vperm.slane %v3041_v43, 3 }
 0x2d7   :  { %913 = vmatpush.msra.mxu3 %v661_v16  ;;  %v983_v47 = vmul.f32 %v971_v29, %v3571_v59  ;;  %v1128_v24 = vsel %vm220_vm2, %v1112_v8, %v2992_v22  ;;  %v1141_v19 = vmul.f32 %v1133_v23, %v3574_v41  ;;  %v1384_v20 = vperm.slane %v3205_v25, 1  ;;  %v3575_v7 = vld [vmem:[#allocation20_spill] sm:$0xff] }
 0x2d8   :  { %853 = vmatpush.msra.mxu0 %v658_v36  ;;  %1052 = vmatpush.msrb.mxu2 %v978_v37  ;;  %v979_v56 = vmul.f32 %v971_v29, %v3575_v7  ;;  %v1116_v2 = vsel %vm220_vm2, %v1104_v61, %v1112_v8  ;;  %v1151_v22 = vmul.f32 %v1131_v18, %v1128_v24  ;;  %v3576_v29 = vld [vmem:[#allocation36_spill] sm:$0xff]  ;;  %v3589_v24 = vld [vmem:[#allocation18_spill] sm:$0xff]  ;;  %v1383_v41 = vperm.slane %v3205_v25, 0 }
 0x2d9   :  { %2041 = vmatmul.msk.f32.vlgmr.msra.gmra.mxu0 %vm751_vm10, %v3047_v26  ;;  %2044 = vmatmul.msk.f32.vlgmr.msra.gmra.mxu3 %vm751_vm10, %v3047_v26  ;;  %v3572_v26 = vld [vmem:[#allocation30_spill] sm:$0xff]  ;;  %v1147_v16 = vmul.f32 %v1131_v18, %v2885_v53  ;;  %v1150_v43 = vmul.f32 %v1134_v42, %v2903_v54  ;;  %v1143_v46 = vmul.f32 %v1131_v18, %v3576_v29  ;;  %v3578_v54 = vld [vmem:[#allocation11_spill] sm:$0xff]  ;;  %v3596_v29 = vld [vmem:[#allocation41_spill] sm:$0xff] }
 0x2da   :  { %2049 = vmatmul.msk.f32.vlgmr.msrb.gmra.mxu2 %vm751_vm10, %v3079_v50  ;;  %1009 = vmatpush.msrb.mxu0 %v988_v6  ;;  %v1145_v21 = vmul.f32 %v1133_v23, %v3572_v26  ;;  %v1400_v8 = vmul.f32 %v1384_v20, %v2911_v32  ;;  %v1146_v23 = vmul.f32 %v1134_v42, %v3577_v9  ;;  %v3580_v32 = vld [vmem:[#allocation14_spill] sm:$0xff]  ;;  %v1385_v6 = vperm.slane %v3205_v25, 2 }
 0x2db   :  { %1069 = vmatpush.msrb.mxu3 %v991_v5  ;;  %1212 = vmatpush.msra.mxu2 %v1153_v62  ;;  %v3196_v15 = vpop.permute.xlu2 %1671  ;;  %v1139_v49 = vmul.f32 %v1131_v18, %v3578_v54  ;;  %v1142_v58 = vmul.f32 %v1134_v42, %v3580_v32  ;;  %v3581_v5 = vld [vmem:[#allocation7_spill] sm:$0xff]  ;;  %v3588_v18 = vld [vmem:[#allocation50_spill] sm:$0xff] }
 0x2dc   :  { %1010 = vmatpush.msrb.mxu0 %v984_v38  ;;  %v3200_v1 = vpop.permute.xlu1 %1363  ;;  %v1356_v55 = vpop.permute.xlu0 %1355  ;;  %v3583_v38 = vld [vmem:[#allocation25_spill] sm:$0xff] }
 0x2dd   :  { %1070 = vmatpush.msrb.mxu3 %v987_v51  ;;  %1213 = vmatpush.msra.mxu2 %v1149_v31  ;;  %v1372_v63 = vsel %vm278_vm5, %v2997_v33, %v1356_v55  ;;  %v1154_v33 = vmul.f32 %v1134_v42, %v1116_v2  ;;  %v1368_v39 = vsel %vm278_vm5, %v1356_v55, %v3200_v1  ;;  %v3584_v51 = vld [vmem:[#allocation39_spill] sm:$0xff] }
 0x2de   :  { %1011 = vmatpush.msrb.mxu0 %v980_v0  ;;  %v1404_v36 = vmul.f32 %v1384_v20, %v1372_v63  ;;  %v1405_v48 = vmul.f32 %v1385_v6, %v1368_v39  ;;  %v2068_v31 = vld [vmem:[%s3499_s4 + $0x6] ss:$8 sm:$0xf]  ;;  %v1401_v0 = vmul.f32 %v1385_v6, %v3585_v17 }
 0x2df   :  { %1071 = vmatpush.msrb.mxu3 %v983_v47  ;;  %1214 = vmatpush.msra.mxu2 %v1145_v21  ;;  %v3265_v47 = vld [vmem:[%s3501_s2 + $0x14] sm:$0x7]  ;;  %v1547_v26 = vperm.slane %v2068_v31, 1  ;;  %v1548_v42 = vperm.slane %v2068_v31, 2  ;;  %v1546_v32 = vperm.slane %v2068_v31, 0 }
 0x2e0   :  { %1012 = vmatpush.msrb.mxu0 %v976_v34  ;;  %1444 = vmatpush.msra.mxu1 %v1404_v36  ;;  %v3586_v21 = vld [vmem:[#allocation8_spill] sm:$0xff]  ;;  %v1397_v34 = vmul.f32 %v1385_v6, %v3587_v27 }
 0x2e1   :  { %1072 = vmatpush.msrb.mxu3 %v979_v56  ;;  %1215 = vmatpush.msra.mxu2 %v1141_v19  ;;  %v1386_v19 = vperm.slane %v3205_v25, 3  ;;  %v3594_v25 = vld [vmem:[#allocation3_spill] sm:$0xff]  ;;  %v1566_v27 = vmul.f32 %v1546_v32, %v3072_v40 }
 0x2e2   :  { %2047 = vmatmul.msk.f32.vlgmr.msrb.gmra.mxu0 %vm751_vm10, %v3079_v50  ;;  %2050 = vmatmul.msk.f32.vlgmr.msrb.gmra.mxu3 %vm751_vm10, %v3079_v50 }
 0x2e3   :  { %1172 = vmatpush.msra.mxu0 %v1151_v22  ;;  %2055 = vmatmul.msk.f32.vlgmr.msra.gmra.mxu2 %vm751_vm10, %v3104_v10  ;;  %v3230_v61 = vpop.permute.xlu2 %1852  ;;  %v3592_v22 = vld [vmem:[#allocation6_spill] sm:$0xff] }
 0x2e4   :  { %1232 = vmatpush.msra.mxu3 %v1154_v33  ;;  %1301 = vmatpush.msrb.mxu2 %v2775_v14  ;;  %v3234_v50 = vpop.permute.xlu1 %1689  ;;  %v3236_v53 = vpop.permute.xlu0 %1526  ;;  %v3579_v14 = vld [vmem:[#allocation34_spill] sm:$0xff] }
 0x2e5   :  { %1173 = vmatpush.msra.mxu0 %v1147_v16  ;;  %v1396_v37 = vmul.f32 %v1384_v20, %v3579_v14  ;;  %1445 = vmatpush.msra.mxu1 %v1400_v8  ;;  %v3597_v8 = vld [vmem:[#allocation45_spill] sm:$0xff] }
 0x2e6   :  { %1233 = vmatpush.msra.mxu3 %v1150_v43  ;;  %1302 = vmatpush.msrb.mxu2 %v2576_v11  ;;  %v3582_v11 = vld [vmem:[#allocation16_spill] sm:$0xff]  ;;  %v1402_v9 = vmul.f32 %v1386_v19, %v3597_v8 }
 0x2e7   :  { %1174 = vmatpush.msra.mxu0 %v1143_v46  ;;  %1446 = vmatpush.msra.mxu1 %v1396_v37  ;;  %v1392_v62 = vmul.f32 %v1384_v20, %v3582_v11  ;;  %v3590_v20 = vld [vmem:[#allocation5_spill] sm:$0xff]  ;;  %v3595_v43 = vld [vmem:[#allocation4_spill] sm:$0xff]  ;;  %v1399_v46 = vmul.f32 %v1383_v41, %v3596_v29 }
 0x2e8   :  { %1234 = vmatpush.msra.mxu3 %v1146_v23  ;;  %1303 = vmatpush.msrb.mxu2 %v3581_v5  ;;  %v3599_v37 = vld [vmem:[#allocation49_spill] sm:$0xff]  ;;  %v3601_v5 = vld [vmem:[#allocation48_spill] sm:$0xff] }
 0x2e9   :  { %1175 = vmatpush.msra.mxu0 %v1139_v49  ;;  %1447 = vmatpush.msra.mxu1 %v1392_v62  ;;  %v3598_v49 = vld [vmem:[#allocation24_spill] sm:$0xff]  ;;  %v1563_v39 = vmul.f32 %v1547_v26, %v3599_v37  ;;  %v1564_v11 = vmul.f32 %v1548_v42, %v3601_v5  ;;  %v3602_v62 = vld [vmem:[#allocation9_spill] sm:$0xff] }
 0x2ea   :  { %1235 = vmatpush.msra.mxu3 %v1142_v58  ;;  %1304 = vmatpush.msrb.mxu2 %v2392_v35  ;;  %v1395_v14 = vmul.f32 %v1383_v41, %v3598_v49  ;;  %v3600_v58 = vld [vmem:[#allocation31_spill] sm:$0xff]  ;;  %v3614_v37 = vld [vmem:[#allocation32_spill] sm:$0xff] }
 0x2eb   :  { %1261 = vmatpush.msrb.mxu0 %v3583_v38  ;;  %2056 = vmatmul.msk.f32.vlgmr.msra.gmra.mxu3 %vm751_vm10, %v3104_v10  ;;  %v3270_v55 = vpop.permute.xlu2 %1844  ;;  %v1549_v38 = vperm.slane %v2068_v31, 3  ;;  %v3607_v31 = vld [vmem:[#allocation42_spill] sm:$0xff]  ;;  %v3616_v5 = vld [vmem:[#allocation52_spill] sm:$0xff] }
 0x2ec   :  { %1321 = vmatpush.msrb.mxu3 %v3584_v51  ;;  %1464 = vmatpush.msra.mxu2 %v1405_v48  ;;  %v3260_v59 = vpop.permute.xlu1 %1681  ;;  %v1519_v35 = vpop.permute.xlu0 %1518  ;;  %v1391_v48 = vmul.f32 %v1383_v41, %v3602_v62  ;;  %v3603_v51 = vld [vmem:[#allocation38_spill] sm:$0xff] }
 0x2ed   :  { %2053 = vmatmul.msk.f32.vlgmr.msra.gmra.mxu0 %vm751_vm10, %v3104_v10  ;;  %2060 = vmatmul.msk.f32.vlgmr.msrb.gmra.mxu2 %vm751_vm10, %v3144_v4  ;;  %v1380_v10 = vsel %vm278_vm5, %v3200_v1, %v3588_v18  ;;  %v1535_v63 = vsel %vm321_vm7, %v3064_v12, %v1519_v35  ;;  %v1531_v7 = vsel %vm321_vm7, %v1519_v35, %v3236_v53  ;;  %v3591_v1 = vld [vmem:[#allocation17_spill] sm:$0xff]  ;;  %v3593_v12 = vld [vmem:[#allocation51_spill] sm:$0xff] }
 0x2ee   :  { %1262 = vmatpush.msrb.mxu0 %v3586_v21  ;;  %1322 = vmatpush.msrb.mxu3 %v3589_v24  ;;  %v1567_v56 = vmul.f32 %v1547_v26, %v1535_v63  ;;  %v1393_v2 = vmul.f32 %v1385_v6, %v3591_v1  ;;  %v1403_v36 = vmul.f32 %v1383_v41, %v3593_v12  ;;  %v3604_v35 = vld [vmem:[#allocation15_spill] sm:$0xff]  ;;  %v3608_v41 = vld [vmem:[#allocation22_spill] sm:$0xff]  ;;  %v3610_v1 = vld [vmem:[#allocation13_spill] sm:$0xff] }
 0x2ef   :  { %1465 = vmatpush.msra.mxu2 %v1401_v0  ;;  %2065 = vmatmul.msk.f32.vlgmr.msra.gmra.mxu1 %vm751_vm10, %v3265_v47  ;;  %v1406_v33 = vmul.f32 %v1386_v19, %v1380_v10  ;;  %v1568_v16 = vmul.f32 %v1548_v42, %v1531_v7  ;;  %v1398_v6 = vmul.f32 %v1386_v19, %v3600_v58  ;;  %v2074_v63 = vld [vmem:[%s3499_s4 + $0x7] ss:$8 sm:$0xf] }
 0x2f0   :  { %1263 = vmatpush.msrb.mxu0 %v3590_v20  ;;  %1323 = vmatpush.msrb.mxu3 %v3592_v22  ;;  %v1559_v17 = vmul.f32 %v1547_v26, %v3603_v51  ;;  %v1394_v21 = vmul.f32 %v1386_v19, %v3604_v35  ;;  %v1562_v24 = vmul.f32 %v1546_v32, %v3607_v31  ;;  %v3609_v20 = vld [vmem:[#allocation47_spill] sm:$0xff]  ;;  %v3615_v58 = vld [vmem:[#allocation40_spill] sm:$0xff] }
 0x2f1   :  { %1466 = vmatpush.msra.mxu2 %v1397_v34  ;;  %1607 = vmatpush.msrb.mxu1 %v1567_v56  ;;  %v3605_v34 = vld [vmem:[#allocation37_spill] sm:$0xff]  ;;  %v1698_v40 = vsel %vm364_vm6, %v3139_v13, %v3260_v59  ;;  %v1556_v19 = vmul.f32 %v1548_v42, %v3608_v41  ;;  %v1565_v7 = vmul.f32 %v1549_v38, %v3609_v20  ;;  %v3332_v56 = vperm.slane %v2074_v63, 1  ;;  %v3611_v22 = vld [vmem:[#allocation23_spill] sm:$0xff] }
 0x2f2   :  { %1264 = vmatpush.msrb.mxu0 %v3594_v25  ;;  %1324 = vmatpush.msrb.mxu3 %v3595_v43  ;;  %v1560_v18 = vmul.f32 %v1548_v42, %v3605_v34  ;;  %v1557_v12 = vmul.f32 %v1549_v38, %v3611_v22  ;;  %v3343_v42 = vld [vmem:[%s3501_s2 + $0x18] sm:$0x7]  ;;  %v1697_v43 = vsel %vm364_vm6, %v3196_v15, %v3111_v52 }
 0x2f3   :  { %1467 = vmatpush.msra.mxu2 %v1393_v2  ;;  %2061 = vmatmul.msk.f32.vlgmr.msrb.gmra.mxu3 %vm751_vm10, %v3144_v4  ;;  %v3316_v0 = vpop.permute.xlu2 %1824  ;;  %v1554_v2 = vmul.f32 %v1546_v32, %v3610_v1  ;;  %v1730_v29 = vmul.f32 %v3332_v56, %v1698_v40  ;;  %v1701_v62 = vsel %vm364_vm6, %v3615_v58, %v3196_v15 }
 0x2f4   :  { %1424 = vmatpush.msra.mxu0 %v1403_v36  ;;  %1484 = vmatpush.msra.mxu3 %v1406_v33  ;;  %v3300_v23 = vpop.permute.xlu1 %1828  ;;  %v3302_v54 = vpop.permute.xlu0 %1675  ;;  %v1711_v36 = vperm.slane %v2074_v63, 2  ;;  %v1857_v15 = vsel %vm407_vm8, %v3270_v55, %v3230_v61 }
 0x2f5   :  { %2058 = vmatmul.msk.f32.vlgmr.msrb.gmra.mxu0 %vm751_vm10, %v3144_v4  ;;  %2066 = vmatmul.msk.f32.vlgmr.msra.gmra.mxu2 %vm751_vm10, %v3265_v47  ;;  %v1543_v4 = vsel %vm321_vm7, %v3236_v53, %v3031_v57  ;;  %v3606_v53 = vld [vmem:[#allocation19_spill] sm:$0xff] }
 0x2f6   :  { %1425 = vmatpush.msra.mxu0 %v1399_v46  ;;  %1485 = vmatpush.msra.mxu3 %v1402_v9  ;;  %v1569_v57 = vmul.f32 %v1549_v38, %v1543_v4  ;;  %v1555_v10 = vmul.f32 %v1547_v26, %v3606_v53  ;;  %v1694_v26 = vsel %vm364_vm6, %v3260_v59, %v3234_v50  ;;  %v3613_v46 = vld [vmem:[#allocation27_spill] sm:$0xff]  ;;  %v1709_v9 = vperm.slane %v2074_v63, 0 }
 0x2f7   :  { %1627 = vmatpush.msrb.mxu2 %v1568_v16  ;;  %1608 = vmatpush.msrb.mxu1 %v1563_v39  ;;  %v3612_v16 = vld [vmem:[#allocation46_spill] sm:$0xff]  ;;  %v1558_v8 = vmul.f32 %v1546_v32, %v3613_v46  ;;  %v1731_v49 = vmul.f32 %v1711_v36, %v1694_v26  ;;  %v1561_v39 = vmul.f32 %v1549_v38, %v3614_v37  ;;  %v1712_v32 = vperm.slane %v2074_v63, 3 }
 0x2f8   :  { %1426 = vmatpush.msra.mxu0 %v1395_v14  ;;  %1486 = vmatpush.msra.mxu3 %v1398_v6  ;;  %v1693_v59 = vsel %vm364_vm6, %v3111_v52, %v3612_v16  ;;  %v3360_v14 = vld [vmem:[%s3499_s4 + $0x20] ss:$8 sm:$0xf]  ;;  %v1705_v6 = vsel %vm364_vm6, %v3612_v16, %v3615_v58  ;;  %v1706_v4 = vsel %vm364_vm6, %v3234_v50, %v3616_v5 }
 0x2f9   :  { %1628 = vmatpush.msrb.mxu2 %v1564_v11  ;;  %1609 = vmatpush.msrb.mxu1 %v1559_v17  ;;  %v1702_v11 = vsel %vm364_vm6, %v3616_v5, %v3139_v13  ;;  %v3390_v13 = vperm.slane %v3360_v14, 2  ;;  %v1723_v51 = vmul.f32 %v1711_v36, %v3094_v60  ;;  %v1728_v35 = vmul.f32 %v1712_v32, %v1705_v6 }
 0x2fa   :  { %1427 = vmatpush.msra.mxu0 %v1391_v48  ;;  %1487 = vmatpush.msra.mxu3 %v1394_v21  ;;  %v1691_v48 = vsel %vm364_vm6, %v3302_v54, %v3150_v30  ;;  %v1729_v17 = vmul.f32 %v1709_v9, %v1702_v11  ;;  %v1732_v21 = vmul.f32 %v1712_v32, %v1706_v4  ;;  %v1875_v40 = vperm.slane %v3360_v14, 3 }
 0x2fb   :  { %1629 = vmatpush.msrb.mxu2 %v1560_v18  ;;  %1610 = vmatpush.msrb.mxu1 %v1555_v10  ;;  %v3399_v38 = vpop.permute.xlu2 %1822  ;;  %v1725_v18 = vmul.f32 %v1709_v9, %v1701_v62  ;;  %v1894_v31 = vmul.f32 %v3390_v13, %v1857_v15  ;;  %v1873_v46 = vperm.slane %v3360_v14, 1 }
 0x2fc   :  { %1587 = vmatpush.msrb.mxu0 %v1566_v27  ;;  %1647 = vmatpush.msrb.mxu3 %v1569_v57  ;;  %v3345_v33 = vpop.permute.xlu1 %1826  ;;  %v1670_v25 = vpop.permute.xlu0 %1669  ;;  %v3617_v27 = vld [vmem:[#allocation26_spill] sm:$0xff]  ;;  %v1719_v57 = vmul.f32 %v1711_v36, %v1691_v48 }
 0x2fd   :  { %1630 = vmatpush.msrb.mxu2 %v1556_v19  ;;  %2064 = vmatmul.msk.f32.vlgmr.msra.gmra.mxu0 %vm751_vm10, %v3265_v47  ;;  %v1696_v52 = vsel %vm364_vm6, %v1670_v25, %v3085_v45  ;;  %v1726_v45 = vmul.f32 %v3332_v56, %v1697_v43  ;;  %v1700_v34 = vsel %vm364_vm6, %v3617_v27, %v1670_v25  ;;  %v2075_v19 = vld [vmem:[%s3501_s2 + $0x1c] sm:$0x7]  ;;  %v2109_v25 = vmov 0  }
 0x2fe   :  { %1588 = vmatpush.msrb.mxu0 %v1562_v24  ;;  %1648 = vmatpush.msrb.mxu3 %v1565_v7  ;;  %v1722_v50 = vmul.f32 %v3332_v56, %v1696_v52  ;;  %v1704_v60 = vsel %vm364_vm6, %v3066_v3, %v3617_v27  ;;  %v1703_v3 = vsel %vm364_vm6, %v3150_v30, %v3114_v28  ;;  %v2081_v52 = vld [vmem:[%s3501_s2 + $0x20] sm:$0x7] }
 0x2ff   :  { %2067 = vmatmul.msk.f32.vlgmr.msra.gmra.mxu3 %vm751_vm10, %v3265_v47  ;;  %2072 = vmatmul.msk.f32.vlgmr.msrb.gmra.mxu2 %vm751_vm10, %v3343_v42  ;;  %v1727_v47 = vmul.f32 %v1711_v36, %v1693_v59  ;;  %v1721_v41 = vmul.f32 %v1709_v9, %v1700_v34  ;;  %v1724_v20 = vmul.f32 %v1712_v32, %v1704_v60 }
 0x300   :  { %1770 = vmatpush.msra.mxu1 %v1730_v29  ;;  %1790 = vmatpush.msra.mxu2 %v1731_v49  ;;  %v1869_v7 = vsel %vm407_vm8, %v3230_v61, %v3300_v23 }
 0x301   :  { %1589 = vmatpush.msrb.mxu0 %v1558_v8  ;;  %2071 = vmatmul.msk.f32.vlgmr.msrb.gmra.mxu1 %vm751_vm10, %v3343_v42  ;;  %v1895_v26 = vmul.f32 %v1875_v40, %v1869_v7  ;;  %v1872_v8 = vperm.slane %v3360_v14, 0 }
 0x302   :  { %1649 = vmatpush.msrb.mxu3 %v1561_v39  ;;  %1771 = vmatpush.msra.mxu1 %v1726_v45 }
 0x303   :  { %1791 = vmatpush.msra.mxu2 %v1727_v47  ;;  %1590 = vmatpush.msrb.mxu0 %v1554_v2  ;;  %v1847_v1 = vpop.permute.xlu2 %1846  ;;  %v1985_v2 = vld [vmem:[%s3502_s3] sm:$0x7] }
 0x304   :  { %1650 = vmatpush.msrb.mxu3 %v1557_v12  ;;  %v1668_v53 = vpop.permute.xlu1 %1667  ;;  %v1851_v10 = vpop.permute.xlu0 %1850  ;;  %1772 = vmatpush.msra.mxu1 %v1722_v50  ;;  %v1866_v16 = vsel %vm407_vm8, %v1847_v1, %v3399_v38 }
 0x305   :  { %1750 = vmatpush.msra.mxu0 %v1729_v17  ;;  %1792 = vmatpush.msra.mxu2 %v1723_v51  ;;  %v1695_v24 = vsel %vm364_vm6, %v1668_v53, %v3302_v54  ;;  %v1699_v63 = vsel %vm364_vm6, %v3114_v28, %v1668_v53  ;;  %v1868_v28 = vsel %vm407_vm8, %v1851_v10, %v3345_v33 }
 0x306   :  { %1810 = vmatpush.msra.mxu3 %v1732_v21  ;;  %v1718_v54 = vmul.f32 %v3332_v56, %v1695_v24  ;;  %2070 = vmatmul.msk.f32.vlgmr.msrb.gmra.mxu0 %vm751_vm10, %v3343_v42  ;;  %v1717_v30 = vmul.f32 %v1709_v9, %v1699_v63  ;;  %v1720_v56 = vmul.f32 %v1712_v32, %v1703_v3 }
 0x307   :  { %1751 = vmatpush.msra.mxu0 %v1725_v18  ;;  %1793 = vmatpush.msra.mxu2 %v1719_v57  ;;  %v1891_v61 = vmul.f32 %v1875_v40, %v1868_v28  ;;  %v1883_v29 = vmul.f32 %v1875_v40, %v1866_v16 }
 0x308   :  { %1811 = vmatpush.msra.mxu3 %v1728_v35  ;;  %2078 = vmatmul.msk.f32.vlgmr.msra.gmra.mxu2 %vm751_vm10, %v2075_v19 }
 0x309   :  { %1953 = vmatpush.msrb.mxu2 %v1894_v31  ;;  %2073 = vmatmul.msk.f32.vlgmr.msrb.gmra.mxu3 %vm751_vm10, %v3343_v42 }
 0x30a   :  { %1812 = vmatpush.msra.mxu3 %v1724_v20  ;;  %1752 = vmatpush.msra.mxu0 %v1721_v41 }
 0x30b   :  { %1773 = vmatpush.msra.mxu1 %v1718_v54  ;;  %2097 = vset.pattern.permute.xlu1 %v2109_v25  ;;  %v1833_v5 = vpop.permute.xlu2 %1832 }
 0x30c   :  { %1813 = vmatpush.msra.mxu3 %v1720_v56  ;;  %2077 = vmatmul.msk.f32.vlgmr.msra.gmra.mxu1 %vm751_vm10, %v2075_v19  ;;  %v1849_v22 = vpop.permute.xlu1 %1848  ;;  %v1843_v12 = vpop.permute.xlu0 %1842  ;;  %v1863_v47 = vsel %vm407_vm8, %v3316_v0, %v1833_v5 }
 0x30d   :  { %1753 = vmatpush.msra.mxu0 %v1717_v30  ;;  %v1867_v36 = vsel %vm407_vm8, %v1849_v22, %v3316_v0  ;;  %v1856_v42 = vsel %vm407_vm8, %v1843_v12, %v1851_v10  ;;  %2098 = vset.pattern.permute.xlu0 %v2109_v25  ;;  %v1884_v0 = vmul.f32 %v1872_v8, %v1863_v47 }
 0x30e   :  { %1973 = vmatpush.msrb.mxu3 %v1895_v26  ;;  %v1887_v59 = vmul.f32 %v1875_v40, %v1867_v36  ;;  %v1890_v43 = vmul.f32 %v3390_v13, %v1856_v42  ;;  %1988 = vperm.xlu1 %2097, %v1985_v2  }
 0x30f   :  { %2076 = vmatmul.msk.f32.vlgmr.msra.gmra.mxu0 %vm751_vm10, %v2075_v19 }
 0x310   :  { %1974 = vmatpush.msrb.mxu3 %v1891_v61  ;;  %1954 = vmatpush.msrb.mxu2 %v1890_v43 }
 0x311   :  { %2079 = vmatmul.msk.f32.vlgmr.msra.gmra.mxu3 %vm751_vm10, %v2075_v19 }
 0x312   :  { %1975 = vmatpush.msrb.mxu3 %v1887_v59 }
 0x314   :  { %1976 = vmatpush.msrb.mxu3 %v1883_v29  ;;  %v1841_v9 = vpop.permute.xlu1 %1840  ;;  %v1837_v49 = vpop.permute.xlu0 %1836 }
 0x315   :  { %v1855_v37 = vsel %vm407_vm8, %v1841_v9, %v1849_v22  ;;  %v1861_v39 = vsel %vm407_vm8, %v1837_v49, %v3270_v55  ;;  %v1865_v32 = vsel %vm407_vm8, %v3300_v23, %v1837_v49  ;;  %v1859_v23 = vsel %vm407_vm8, %v1833_v5, %v1841_v9 }
 0x316   :  { %v1886_v58 = vmul.f32 %v3390_v13, %v1855_v37  ;;  %v1892_v14 = vmul.f32 %v1872_v8, %v1865_v32  ;;  %v1893_v6 = vmul.f32 %v1873_v46, %v1861_v39  ;;  %v1885_v17 = vmul.f32 %v1873_v46, %v1859_v23 }
 0x318   :  { %1913 = vmatpush.msrb.mxu0 %v1892_v14  ;;  %1933 = vmatpush.msrb.mxu1 %v1893_v6 }
 0x319   :  { %2085 = vmatmul.msk.f32.vlgmr.msrb.gmra.mxu3 %vm751_vm10, %v2081_v52  ;;  %1955 = vmatpush.msrb.mxu2 %v1886_v58 }
 0x31c   :  { %v1839_v11 = vpop.permute.xlu1 %1838  ;;  %v1835_v45 = vpop.permute.xlu0 %1834 }
 0x31d   :  { %v1854_v55 = vsel %vm407_vm8, %v1839_v11, %v1847_v1  ;;  %v1860_v62 = vsel %vm407_vm8, %v1835_v45, %v1843_v12  ;;  %v1864_v48 = vsel %vm407_vm8, %v3345_v33, %v1835_v45 }
 0x31e   :  { %v1882_v4 = vmul.f32 %v3390_v13, %v1854_v55  ;;  %v1888_v50 = vmul.f32 %v1872_v8, %v1864_v48  ;;  %v1889_v51 = vmul.f32 %v1873_v46, %v1860_v62 }
 0x320   :  { %1956 = vmatpush.msrb.mxu2 %v1882_v4  ;;  %1914 = vmatpush.msrb.mxu0 %v1888_v50 }
 0x321   :  { %1934 = vmatpush.msrb.mxu1 %v1889_v51  ;;  %2084 = vmatmul.msk.f32.vlgmr.msrb.gmra.mxu2 %vm751_vm10, %v2081_v52 }
 0x322   :  { %1915 = vmatpush.msrb.mxu0 %v1884_v0 }
 0x323   :  { %1935 = vmatpush.msrb.mxu1 %v1885_v17 }
 0x324   :  { %v1831_v15 = vpop.permute.xlu0 %1830 }
 0x325   :  { %v1858_v13 = vsel %vm407_vm8, %v1831_v15, %v1839_v11  ;;  %v1862_v35 = vsel %vm407_vm8, %v3399_v38, %v1831_v15  ;;  %v792_v60 = vpop.f32.mrf.mxu1 }
 0x326   :  { %v1880_v33 = vmul.f32 %v1872_v8, %v1862_v35  ;;  %v1881_v21 = vmul.f32 %v1873_v46, %v1858_v13 }
 0x328   :  { %1916 = vmatpush.msrb.mxu0 %v1880_v33  ;;  %1936 = vmatpush.msrb.mxu1 %v1881_v21 }
 0x329   :  { %2082 = vmatmul.msk.f32.vlgmr.msrb.gmra.mxu0 %vm751_vm10, %v2081_v52  ;;  %2083 = vmatmul.msk.f32.vlgmr.msrb.gmra.mxu1 %vm751_vm10, %v2081_v52 }
 0x32d   :  { %v875_v10 = vpop.f32.mrf.mxu1 }
 0x32e   :  { %v876_v22 = vadd.f32 %v875_v10, %v792_v60 }
 0x335   :  { %v1034_v44 = vpop.f32.mrf.mxu1 }
 0x336   :  { %v1078_v59 = vadd.f32 %v1034_v44, %v876_v22 }
 0x33d   :  { %v1197_v19 = vpop.f32.mrf.mxu1 }
 0x33e   :  { %v1241_v52 = vadd.f32 %v1197_v19, %v1078_v59 }
 0x346   :  { %v1286_v28 = vpop.f32.mrf.mxu1 }
 0x347   :  { %v1330_v5 = vadd.f32 %v1286_v28, %v1241_v52 }
 0x34b   :  { %v812_v34 = vpop.f32.mrf.mxu2 }
 0x34e   :  { %v772_v18 = vpop.f32.mrf.mxu0 }
 0x352   :  { %v832_v27 = vpop.f32.mrf.mxu3 }
 0x353   :  { %v895_v53 = vpop.f32.mrf.mxu2 }
 0x354   :  { %v896_v12 = vadd.f32 %v895_v53, %v812_v34 }
 0x356   :  { %v855_v31 = vpop.f32.mrf.mxu0 }
 0x357   :  { %v856_v25 = vadd.f32 %v855_v31, %v772_v18 }
 0x35c   :  { %v915_v57 = vpop.f32.mrf.mxu3 }
 0x35d   :  { %v1054_v63 = vpop.f32.mrf.mxu2  ;;  %v916_v2 = vadd.f32 %v915_v57, %v832_v27 }
 0x35e   :  { %v1079_v43 = vadd.f32 %v1054_v63, %v896_v12 }
 0x35f   :  { %v1014_v38 = vpop.f32.mrf.mxu0 }
 0x360   :  { %v1077_v9 = vadd.f32 %v1014_v38, %v856_v25 }
 0x365   :  { %v1074_v24 = vpop.f32.mrf.mxu3 }
 0x366   :  { %v1217_v40 = vpop.f32.mrf.mxu2  ;;  %v1080_v36 = vadd.f32 %v1074_v24, %v916_v2 }
 0x367   :  { %v1242_v37 = vadd.f32 %v1217_v40, %v1079_v43 }
 0x36a   :  { %v1177_v54 = vpop.f32.mrf.mxu0 }
 0x36b   :  { %v1240_v32 = vadd.f32 %v1177_v54, %v1077_v9 }
 0x36c   :  { %v1449_v61 = vpop.f32.mrf.mxu1 }
 0x36d   :  { %v1493_v50 = vadd.f32 %v1449_v61, %v1330_v5 }
 0x36e   :  { %v1237_v3 = vpop.f32.mrf.mxu3 }
 0x36f   :  { %v1243_v29 = vadd.f32 %v1237_v3, %v1080_v36 }
 0x370   :  { %v1306_v20 = vpop.f32.mrf.mxu2 }
 0x371   :  { %v1331_v11 = vadd.f32 %v1306_v20, %v1242_v37 }
 0x372   :  { %v1266_v30 = vpop.f32.mrf.mxu0 }
 0x373   :  { %v1329_v23 = vadd.f32 %v1266_v30, %v1240_v32 }
 0x376   :  { %v1326_v41 = vpop.f32.mrf.mxu3 }
 0x377   :  { %v1332_v49 = vadd.f32 %v1326_v41, %v1243_v29 }
 0x378   :  { %v1469_v56 = vpop.f32.mrf.mxu2 }
 0x379   :  { %v1494_v4 = vadd.f32 %v1469_v56, %v1331_v11 }
 0x37a   :  { %v1429_v1 = vpop.f32.mrf.mxu0 }
 0x37b   :  { %v1492_v51 = vadd.f32 %v1429_v1, %v1329_v23 }
 0x37e   :  { %v1612_v46 = vpop.f32.mrf.mxu1 }
 0x37f   :  { %v1656_v17 = vadd.f32 %v1612_v46, %v1493_v50 }
 0x380   :  { %v1989_v48 = vpop.permute.xlu1 %1988 }
 0x382   :  { %v1489_v7 = vpop.f32.mrf.mxu3  ;;  %v1632_v42 = vpop.f32.mrf.mxu2 }
 0x383   :  { %v1592_v8 = vpop.f32.mrf.mxu0  ;;  %v1495_v39 = vadd.f32 %v1489_v7, %v1332_v49  ;;  %v1657_v0 = vadd.f32 %v1632_v42, %v1494_v4 }
 0x384   :  { %v1655_v15 = vadd.f32 %v1592_v8, %v1492_v51 }
 0x389   :  { %v1775_v45 = vpop.f32.mrf.mxu1 }
 0x38a   :  { %v1819_v27 = vadd.f32 %v1775_v45, %v1656_v17 }
 0x38b   :  { %v1795_v14 = vpop.f32.mrf.mxu2 }
 0x38c   :  { %v1652_v26 = vpop.f32.mrf.mxu3  ;;  %v1755_v55 = vpop.f32.mrf.mxu0  ;;  %v1820_v13 = vadd.f32 %v1795_v14, %v1657_v0 }
 0x38d   :  { %v1658_v58 = vadd.f32 %v1652_v26, %v1495_v39  ;;  %v1818_v21 = vadd.f32 %v1755_v55, %v1655_v15 }
 0x394   :  { %v1815_v16 = vpop.f32.mrf.mxu3 }
 0x395   :  { %v1821_v47 = vadd.f32 %v1815_v16, %v1658_v58 }
 0x39c   :  { %v1978_v6 = vpop.f32.mrf.mxu3 }
 0x39d   :  { %v1984_v62 = vadd.f32 %v1978_v6, %v1821_v47 }
 0x39f   :  { %v1994_v35 = vadd.f32 %v1989_v48, %v1984_v62 }
 0x3a1   :  { %v2000_v57 = vrot.slane %v1994_v35, 4 }
 0x3a4   :  { %v1958_v33 = vpop.f32.mrf.mxu2 }
 0x3a5   :  { %v1983_v34 = vadd.f32 %v1958_v33, %v1820_v13 }
 0x3a6   :  { %v1918_v60 = vpop.f32.mrf.mxu0  ;;  %v1938_v18 = vpop.f32.mrf.mxu1 }
 0x3a7   :  { %v1993_v53 = vadd.f32 %v1989_v48, %v1983_v34  ;;  %v1981_v10 = vadd.f32 %v1918_v60, %v1818_v21  ;;  %v1982_v31 = vadd.f32 %v1938_v18, %v1819_v27 }
 0x3a9   :  { %v2003_v24 = vsel %vm2001_vm11, %v1993_v53, %v2000_v57  ;;  %v1992_v63 = vadd.f32 %v1989_v48, %v1982_v31  ;;  %v1991_v44 = vadd.f32 %v1989_v48, %v1981_v10 }
 0x3aa   :  { %2007 = vst [vmem:[%s3503_s5 + $0x8] sm:$0x77] %v2003_v24 }
 0x3ab   :  { %v1999_v38 = vrot.slane %v1992_v63, 4 }
 0x3ad   :  { %v2002_v3 = vsel %vm2001_vm11, %v1991_v44, %v1999_v38 }
 0x3ae   :  { %2006 = vst [vmem:[%s3503_s5] sm:$0x77] %v2002_v3 }

</bundles_post_ra>
